<compile_context>
chip_gen: v7x
topology: tpu7x:2x2x1
jax: 0.10.0
libtpu: 0.0.40
codegen_flags: <defaults>
</compile_context>

<pallas_src>
import jax
import jax.numpy as jnp
from jax.experimental import pallas as pl
from jax.experimental.pallas import tpu as pltpu

HIDDEN = 512   # fixed by nn.GRU(input_size=512, hidden_size=512) / nn.Linear(512, .)
LANE = 128


# ---------------------------------------------------------------------------
# Kernel A: batched GAP + input projection (non-recurrent, hoisted out of loop).
#   feat block: (RT, HW, C) bf16  -> x = mean_spatial(feat) in f32 -> (RT, C)
#   gi = x @ W_ih + (b_ih + [b_hr, b_hz, 0])                      -> (RT, 3H) f32
# ---------------------------------------------------------------------------
def _gap_proj_kernel(feat_ref, wih_ref, bgi_ref, gi_ref):
    feat = feat_ref[...].astype(jnp.float32)              # f32 GAP accumulation
    x = jnp.mean(feat, axis=1)                            # (RT, C)
    gi_ref[...] = (jnp.dot(x.astype(jnp.bfloat16), wih_ref[...],
                           preferred_element_type=jnp.float32) + bgi_ref[...])


# ---------------------------------------------------------------------------
# Kernel B: the serial GRU recurrence, T_CHUNK steps per grid iteration.
#   gi block  : (T_CHUNK, B, 3H) f32   (streamed / prefetched)
#   W_hh      : (H, 3H) bf16           (resident, constant index_map)
#   b_hn      : (1, H) f32             (resident)
#   h0        : (B, H) f32 = tanh(init_hidden) broadcast (resident)
#   h_seq out : (T_CHUNK, B, H) f32
#   h carried across chunks in a VMEM scratch.
# Gate ordering (r, z, n) matches torch.nn.GRU.
# ---------------------------------------------------------------------------
def _gru_chunk_kernel(gi_ref, h0_ref, whh_ref, bhn_ref, hseq_ref, h_scr):
    c = pl.program_id(0)

    @pl.when(c == 0)
    def _():
        h_scr[...] = h0_ref[...]                           # tanh precomputed in wrapper

    H = HIDDEN
    t_chunk = gi_ref.shape[0]                              # static
    h = h_scr[...]                                         # (B, H) f32

    # Fully unrolled inner loop (static trip count) -> LLO can overlap step t's gate
    # math with step t+1's W_hh matmul issue.
    for t in range(t_chunk):
        gi = gi_ref[t]                                     # (B, 3H) f32, bias pre-folded
        gh = jnp.dot(h.astype(jnp.bfloat16), whh_ref[...],
                     preferred_element_type=jnp.float32)   # (B, 3H) f32, no bias
        r = jax.nn.sigmoid(gi[:, 0:H] + gh[:, 0:H])
        z = jax.nn.sigmoid(gi[:, H:2 * H] + gh[:, H:2 * H])
        n = jnp.tanh(gi[:, 2 * H:] + r * (gh[:, 2 * H:] + bhn_ref[...]))
        h = (1.0 - z) * n + z * h
        hseq_ref[t] = h                                    # deferred FC: only emit h_t

    h_scr[...] = h                                         # carry across chunks


# ---------------------------------------------------------------------------
# Kernel C: batched FC head over all steps (deferred out of the serial loop).
#   preds = h @ W_fc_pad + b_fc_pad     (n_classes padded to 128 lanes -> unmasked vst)
# ---------------------------------------------------------------------------
def _fc_head_kernel(h_ref, wfc_ref, bfc_ref, pred_ref):
    pred_ref[...] = (jnp.dot(h_ref[...].astype(jnp.bfloat16), wfc_ref[...],
                             preferred_element_type=jnp.float32) + bfc_ref[...])


# ---------------------------------------------------------------------------
# Parameter init (deterministic, mirrors CRNN_Model.__init__ shapes).
# GRU / FC weights stored bf16 in (in, out) layout; biases + init_hidden f32.
# ---------------------------------------------------------------------------
def init_params(key, n_classes):
    ks = jax.random.split(key, 7)
    s = 1.0 / jnp.sqrt(jnp.float32(HIDDEN))
    # torch.nn.GRU stores weight_ih_l0 as (3H, in); kept transposed (in, 3H).
    w_ih = jax.random.uniform(ks[0], (HIDDEN, 3 * HIDDEN), jnp.float32, -s, s)
    w_hh = jax.random.uniform(ks[1], (HIDDEN, 3 * HIDDEN), jnp.float32, -s, s)
    b_ih = jax.random.uniform(ks[2], (1, 3 * HIDDEN), jnp.float32, -s, s)
    b_hh = jax.random.uniform(ks[3], (1, 3 * HIDDEN), jnp.float32, -s, s)
    # nn.Linear(512, n_classes): weight (n_classes, 512) -> transposed (512, n_classes)
    w_fc = jax.random.uniform(ks[4], (HIDDEN, n_classes), jnp.float32, -s, s)
    b_fc = jax.random.uniform(ks[5], (1, n_classes), jnp.float32, -s, s)
    # nn.Parameter(torch.randn((1, 1, 512)))
    init_hidden = jax.random.normal(ks[6], (1, 1, HIDDEN), jnp.float32)
    return dict(w_ih=w_ih.astype(jnp.bfloat16), w_hh=w_hh.astype(jnp.bfloat16),
                b_ih=b_ih, b_hh=b_hh,
                w_fc=w_fc.astype(jnp.bfloat16), b_fc=b_fc,
                init_hidden=init_hidden)


# ---------------------------------------------------------------------------
# Forward: kernel A (batched GAP+proj)  ->  kernel B (chunked recurrence)
#          ->  kernel C (batched FC head).
# ---------------------------------------------------------------------------
def crnn_forward(features, params, *, t_chunk=4):
    """features: (n_steps, B, C=512, Hs, Ws) f32 — stand-in for retina_net(img_warp)
    at each step.  Returns (preds (n_steps, B, n_classes), final hidden (B, 512))."""
    n_steps, B, C, Hs, Ws = features.shape
    assert C == HIDDEN
    HW = Hs * Ws
    n_classes = params["w_fc"].shape[1]
    n_pad = pl.cdiv(n_classes, LANE) * LANE        # lane-dense prediction width

    n_chunks = pl.cdiv(n_steps, t_chunk)
    n_steps_pad = n_chunks * t_chunk
    rows = n_steps_pad * B
    rt = t_chunk * B                               # rows per grid step for A / C

    # One up-front NCHW -> (steps, B, HW, C) layout change (channels on lanes,
    # spatial on sublanes), cast to bf16 to halve the streamed DMA, pad time axis.
    feats = jnp.transpose(features, (0, 1, 3, 4, 2)).reshape(n_steps, B, HW, C)
    feats = feats.astype(jnp.bfloat16)
    if n_steps_pad != n_steps:
        feats = jnp.pad(feats, ((0, n_steps_pad - n_steps), (0, 0), (0, 0), (0, 0)))
    feats_flat = feats.reshape(rows, HW, C)

    # Bias folding: gi absorbs b_ih and the r/z slices of b_hh; only b_hn stays in-loop.
    b_gi = params["b_ih"] + jnp.concatenate(
        [params["b_hh"][:, :2 * HIDDEN], jnp.zeros((1, HIDDEN), jnp.float32)], axis=1)
    b_hn = params["b_hh"][:, 2 * HIDDEN:]

    # Precompute tanh(init_hidden) broadcast over the batch (no EUP tanh at t==0).
    h0 = jnp.broadcast_to(jnp.tanh(params["init_hidden"].reshape(1, HIDDEN)),
                          (B, HIDDEN)).astype(jnp.float32)

    const2 = lambda i: (0, 0)

    # -- Kernel A: batched GAP + input projection (parallel over time chunks) --------
    gi_flat = pl.pallas_call(
        _gap_proj_kernel,
        grid=(n_chunks,),
        in_specs=[
            pl.BlockSpec((rt, HW, C), lambda r: (r, 0, 0)),        # streamed bf16 feats
            pl.BlockSpec((HIDDEN, 3 * HIDDEN), const2),            # resident W_ih
            pl.BlockSpec((1, 3 * HIDDEN), const2),                 # folded bias
        ],
        out_specs=pl.BlockSpec((rt, 3 * HIDDEN), lambda r: (r, 0)),
        out_shape=jax.ShapeDtypeStruct((rows, 3 * HIDDEN), jnp.float32),
        compiler_params=pltpu.CompilerParams(dimension_semantics=("parallel",)),
    )(feats_flat, params["w_ih"], b_gi)
    gi = gi_flat.reshape(n_steps_pad, B, 3 * HIDDEN)

    # -- Kernel B: serial GRU recurrence, T_CHUNK steps per grid iteration -----------
    h_seq = pl.pallas_call(
        _gru_chunk_kernel,
        grid=(n_chunks,),
        in_specs=[
            pl.BlockSpec((t_chunk, B, 3 * HIDDEN), lambda c: (c, 0, 0)),  # streamed gi
            pl.BlockSpec((B, HIDDEN), const2),                            # h0 (resident)
            pl.BlockSpec((HIDDEN, 3 * HIDDEN), const2),                   # W_hh resident
            pl.BlockSpec((1, HIDDEN), const2),                            # b_hn resident
        ],
        out_specs=pl.BlockSpec((t_chunk, B, HIDDEN), lambda c: (c, 0, 0)),
        out_shape=jax.ShapeDtypeStruct((n_steps_pad, B, HIDDEN), jnp.float32),
        scratch_shapes=[pltpu.VMEM((B, HIDDEN), jnp.float32)],            # carried h
        compiler_params=pltpu.CompilerParams(dimension_semantics=("arbitrary",)),
    )(gi, h0, params["w_hh"], b_hn)

    # -- Kernel C: batched FC head, lane-dense padded output -------------------------
    w_fc_p = jnp.zeros((HIDDEN, n_pad), jnp.bfloat16).at[:, :n_classes].set(params["w_fc"])
    b_fc_p = jnp.zeros((1, n_pad), jnp.float32).at[:, :n_classes].set(params["b_fc"])
    h_flat = h_seq.reshape(rows, HIDDEN)
    preds_flat = pl.pallas_call(
        _fc_head_kernel,
        grid=(n_chunks,),
        in_specs=[
            pl.BlockSpec((rt, HIDDEN), lambda r: (r, 0)),
            pl.BlockSpec((HIDDEN, n_pad), const2),
            pl.BlockSpec((1, n_pad), const2),
        ],
        out_specs=pl.BlockSpec((rt, n_pad), lambda r: (r, 0)),
        out_shape=jax.ShapeDtypeStruct((rows, n_pad), jnp.float32),
        compiler_params=pltpu.CompilerParams(dimension_semantics=("parallel",)),
    )(h_flat, w_fc_p, b_fc_p)

    preds = preds_flat.reshape(n_steps_pad, B, n_pad)[:n_steps, :, :n_classes]
    h_final = h_seq[n_steps - 1]
    return preds, h_final


# ---------------------------------------------------------------------------
# Pure-JAX reference (standard, un-folded torch.nn.GRU gate math; same bf16
# feature/weight casts as the kernel path) for a correctness check.
# ---------------------------------------------------------------------------
def crnn_reference(features, params):
    n_steps, B, C, Hs, Ws = features.shape
    n_classes = params["w_fc"].shape[1]
    feats = jnp.transpose(features, (0, 1, 3, 4, 2)).reshape(n_steps, B, Hs * Ws, C)
    feats = feats.astype(jnp.bfloat16)     # same streamed dtype as the kernel path
    h = jnp.broadcast_to(jnp.tanh(params["init_hidden"].reshape(1, HIDDEN)), (B, HIDDEN))
    preds = []
    for t in range(n_steps):
        x = jnp.mean(feats[t].astype(jnp.float32), axis=1)
        gi = jnp.dot(x.astype(jnp.bfloat16), params["w_ih"],
                     preferred_element_type=jnp.float32) + params["b_ih"]
        gh = jnp.dot(h.astype(jnp.bfloat16), params["w_hh"],
                     preferred_element_type=jnp.float32) + params["b_hh"]
        r = jax.nn.sigmoid(gi[:, :HIDDEN] + gh[:, :HIDDEN])
        z = jax.nn.sigmoid(gi[:, HIDDEN:2 * HIDDEN] + gh[:, HIDDEN:2 * HIDDEN])
        n = jnp.tanh(gi[:, 2 * HIDDEN:] + r * gh[:, 2 * HIDDEN:])
        h = (1.0 - z) * n + z * h
        pred = jnp.dot(h.astype(jnp.bfloat16), params["w_fc"],
                       preferred_element_type=jnp.float32) + params["b_fc"]
        preds.append(pred)
    return jnp.stack(preds, axis=0), h


if __name__ == "__main__":
    key = jax.random.PRNGKey(0)
    B, n_steps, n_classes = 2, 6, 10      # n_steps=6 with t_chunk=4 exercises padding
    Hs = Ws = 4                           # small spatial size for the synthetic map

    kp, kf = jax.random.split(key)
    params = init_params(kp, n_classes)
    features = jax.random.normal(kf, (n_steps, B, HIDDEN, Hs, Ws), jnp.float32)

    preds, h_final = crnn_forward(features, params, t_chunk=4)
    jax.block_until_ready((preds, h_final))
    assert preds.shape == (n_steps, B, n_classes)
    assert h_final.shape == (B, HIDDEN)

    ref_preds, ref_h = crnn_reference(features, params)
    assert jnp.allclose(preds, ref_preds, atol=2e-2, rtol=2e-2), \
        float(jnp.max(jnp.abs(preds - ref_preds)))
    assert jnp.allclose(h_final, ref_h, atol=2e-2, rtol=2e-2), \
        float(jnp.max(jnp.abs(h_final - ref_h)))
    print("KERNEL_OK")
</pallas_src>

<mosaic_0001>
module attributes {stable_mosaic.version = 11 : i64} {
  func.func @_gap_proj_kernel(%arg0: i32, %arg1: memref<8x16x512xbf16, #tpu.memory_space<vmem>>, %arg2: memref<512x1536xbf16, #tpu.memory_space<vmem>>, %arg3: memref<1x1536xf32, #tpu.memory_space<vmem>>, %arg4: memref<8x1536xf32, #tpu.memory_space<vmem>>) attributes {dimension_semantics = [#tpu.dimension_semantics<parallel>], iteration_bounds = array<i64: 2>, scalar_prefetch = 0 : i64, scratch_operands = 0 : i64, tpu.core_type = #tpu.core_type<tc>, window_params = [{transform_indices = @transform_0, window_bounds = array<i64: 8, 16, 512>}, {pipeline_mode = #tpu.pipeline_mode<synchronous>, transform_indices = @transform_1, window_bounds = array<i64: 512, 1536>}, {pipeline_mode = #tpu.pipeline_mode<synchronous>, transform_indices = @transform_2, window_bounds = array<i64: 1, 1536>}, {transform_indices = @transform_3, window_bounds = array<i64: 8, 1536>}]} {
    %c0 = arith.constant 0 : index
    %c0_0 = arith.constant 0 : index
    %c0_1 = arith.constant 0 : index
    %0 = vector.load %arg1[%c0, %c0_0, %c0_1] : memref<8x16x512xbf16, #tpu.memory_space<vmem>>, vector<8x16x512xbf16>
    %1 = arith.extf %0 : vector<8x16x512xbf16> to vector<8x16x512xf32>
    %cst = arith.constant dense<0.000000e+00> : vector<8x512xf32>
    %2 = vector.multi_reduction <add>, %1, %cst [1] : vector<8x16x512xf32> to vector<8x512xf32>
    %cst_2 = arith.constant 1.600000e+01 : f32
    %3 = vector.broadcast %cst_2 : f32 to vector<8x512xf32>
    %4 = arith.divf %2, %3 : vector<8x512xf32>
    %5 = arith.truncf %4 : vector<8x512xf32> to vector<8x512xbf16>
    %c0_3 = arith.constant 0 : index
    %c0_4 = arith.constant 0 : index
    %6 = vector.load %arg2[%c0_3, %c0_4] : memref<512x1536xbf16, #tpu.memory_space<vmem>>, vector<512x1536xbf16>
    %cst_5 = arith.constant dense<0.000000e+00> : vector<8x1536xf32>
    %7 = tpu.matmul %5, %6, %cst_5 {dimension_numbers = #tpu.dot_dimension_numbers<[1], [0], [0], [1], [0, 0, 1, 1], [], []>} : vector<8x512xbf16>, vector<512x1536xbf16>, vector<8x1536xf32> -> vector<8x1536xf32>
    %c0_6 = arith.constant 0 : index
    %c0_7 = arith.constant 0 : index
    %8 = vector.load %arg3[%c0_6, %c0_7] : memref<1x1536xf32, #tpu.memory_space<vmem>>, vector<1x1536xf32>
    %9 = vector.broadcast %8 : vector<1x1536xf32> to vector<8x1536xf32>
    %10 = arith.addf %7, %9 : vector<8x1536xf32>
    %c0_8 = arith.constant 0 : index
    %c0_9 = arith.constant 0 : index
    %11 = vector.load %arg4[%c0_8, %c0_9] : memref<8x1536xf32, #tpu.memory_space<vmem>>, vector<8x1536xf32>
    tpu.vector_store %arg4[%c0_8, %c0_9], %10 {strides = array<i32>} : memref<8x1536xf32, #tpu.memory_space<vmem>>, vector<8x1536xf32>,
    return
  }
  func.func @transform_0(%arg0: i32) -> (i32, i32, i32) {
    %c0_i32 = arith.constant 0 : i32
    %c0_i32_0 = arith.constant 0 : i32
    %c0_i32_1 = arith.constant 0 : i32
    return %arg0, %c0_i32, %c0_i32_0 : i32, i32, i32
  }
  func.func @transform_1(%arg0: i32) -> (i32, i32) {
    %c0_i32 = arith.constant 0 : i32
    %c0_i32_0 = arith.constant 0 : i32
    %c0_i32_1 = arith.constant 0 : i32
    return %c0_i32, %c0_i32_0 : i32, i32
  }
  func.func @transform_2(%arg0: i32) -> (i32, i32) {
    %c0_i32 = arith.constant 0 : i32
    %c0_i32_0 = arith.constant 0 : i32
    %c0_i32_1 = arith.constant 0 : i32
    return %c0_i32, %c0_i32_0 : i32, i32
  }
  func.func @transform_3(%arg0: i32) -> (i32, i32) {
    %c0_i32 = arith.constant 0 : i32
    %c0_i32_0 = arith.constant 0 : i32
    return %arg0, %c0_i32 : i32, i32
  }
}

</mosaic_0001>

<bundles_post_ra>
// kernel: tpu_custom_call.1
= control target key start
LH: loop header
LB: loop body
LE: loop exit
PB: predicated region body
PF: predicated region fallthrough
CT: control target
= control target key end

     0   :  { %8 = vsyncpa [#allocation3], 0  ;;  %s5475_s0 = inlined_call_operand.hbm [shape: bf16[16,16,512], index: 0, kind: input, shape index: {}]   ;;  %s5476_s1 = inlined_call_operand.hbm [shape: bf16[512,1536], index: 1, kind: input, shape index: {}]   ;;  %s5477_s2 = inlined_call_operand.hbm [shape: f32[1,1536], index: 2, kind: input, shape index: {}]   ;;  %s5478_s3 = inlined_call_operand.hbm [shape: f32[16,1536], index: 3, kind: output, shape index: {}]  }
   0x1   :  { %10 = vsyncpa [#allocation3 + $0x1], 0 }
   0x2   :  { %11 = vsyncpa [#allocation6], 0 }
   0x3   :  { %12 = vsyncpa [#allocation4], 0 }
   0x4   :  { %14 = vsyncpa [#allocation4 + $0x1], 0  ;;  %s4959_s12 = smov 0   ;;  %s4961_s13 = smov 0  }
   0x5   :  { %s4963_s14 = smov 0   ;;  %s4965_s15 = smov 0  }
   0x6 LB: > { %s4980_s16 = sadd.s32 4294967295, %s4929_s15   ;;  %s3686_s17 = sadd.s32 4294967294, %s4929_s15   ;;  %s4929_s15 = sphi %s4965_s15, %s5498_s15   ;;  %s4925_s14 = sphi %s4963_s14, %s5497_s14   ;;  %s4921_s13 = sphi %s4961_s13, %s5496_s13   ;;  %s4917_s12 = sphi %s4959_s12, %s5495_s12  }
   0x7   : > { %p40_p0 = scmp.ne.s32.totalorder %s4921_s13, %s4917_s12  ;;  %p5479_p1 = scmp.eq.s32.totalorder %s4980_s16, 0 }
   0x8   : > { %p112_p3 = scmp.eq.s32.totalorder %s3686_s17, 1  ;;  %p3687_p5 = scmp.ge.s32.totalorder %s4929_s15, 1 }
   0x9   : > { %p4989_p4 = por %p5479_p1, %p40_p0  ;;  %p119_p7 = scmp.lt.s32.totalorder %s4929_s15, 3 }
   0xa   : > { %p4994_p6 = por %p112_p3, %p40_p0  ;;  %s4931_s21 = smov [#allocation5]  }
   0xb   : > { %s5482_s18 = scalar_select %p4989_p4, 1, 0 }
   0xc   : > { %s5483_s19 = scalar_select %p4994_p6, 1, 0 }
   0xd   : > { %p4999_p8 = pnand %p3687_p5, %p119_p7  ;;  %s131_s22 = sshll.u32 %s4931_s21, 4  ;;  %s5003_s22 = int_to_ptr.vmem [resolvable:$true] %s131_s22 }
   0xe   : > { %s4932_s24 = smov [#allocation7]   ;;  %s4773_s28 = scalar_lea.hbm %s5476_s1, 49152 }
   0xf   : > { %p4138_p9 = pneg %p4999_p8  ;;  %s145_s25 = sshll.u32 %s4932_s24, 4  ;;  %s5014_s25 = int_to_ptr.vmem [resolvable:$true] %s145_s25 }
  0x10   : > { %p4774_p12 = scmp.ne.s32.totalorder %s5476_s1, %s4773_s28  ;;  %p4780_p5 = scmp.lt.u32.totalorder %s4773_s28, %s5476_s1 }
  0x11   : > { %p5010_p11 = pnand %p4138_p9, %p5479_p1 }
  0x13   : > { %p4775_p13 = pneg %p5010_p11 }
  0x15   : > { %p4776_p0 = pnand %p4775_p13, %p4774_p12 }
  0x17   : > { %p4777_p3 = pneg %p4776_p0 }
  0x19   : > { %p4782_p7 = pnand %p4780_p5, %p4777_p3 }
  0x1b   : > { %4785 = shalt.err (!%p4782_p7)
}
  0x1c   : > { %s4786_s6 = scalar_lea.vmem %s5003_s22, 49152  ;;  %p4794_p2 = scmp.lt.s32.totalorder %s5003_s22, %s5003_s22 }
  0x1d   : > { %p4787_p9 = scmp.ne.s32.totalorder %s5003_s22, %s4786_s6  ;;  %p4795_p12 = scmp.lt.s32.totalorder %s4786_s6, %s4786_s6 }
  0x1f   : > { %p4789_p10 = pnand %p4787_p9, %p4775_p13  ;;  %p4796_p0 = por %p4795_p12, %p4794_p2 }
  0x21   : > { %p4790_p1 = pneg %p4789_p10 }
  0x23   : > { %p4797_p6 = pnand %p4796_p0, %p4790_p1 }
  0x25   : > { %4800 = shalt.err (!%p4797_p6)
}
  0x26   : > { %s4933_s7 = smov 768   ;;  %s4934_s8 = smov 48  }
  0x27   : > { %4141 = dma.hbm_to_vmem [thread:$0]  (!%p5010_p11), %s5476_s1, 49152, %s5003_s22, [#allocation6], %s4933_s7, %s4933_s7, %s4934_s8  }
  0x28   : > { %s4801_s21 = scalar_lea.hbm %s5477_s2, 192 }
  0x29   : > { %p4802_p2 = scmp.ne.s32.totalorder %s5477_s2, %s4801_s21  ;;  %p4808_p10 = scmp.lt.u32.totalorder %s4801_s21, %s5477_s2 }
  0x2b   : > { %p4804_p1 = pnand %p4802_p2, %p4775_p13 }
  0x2d   : > { %p4805_p6 = pneg %p4804_p1 }
  0x2f   : > { %p4810_p3 = pnand %p4808_p10, %p4805_p6 }
  0x31   : > { %4813 = shalt.err (!%p4810_p3)
}
  0x32   : > { %s4814_s22 = scalar_lea.vmem %s5014_s25, 192  ;;  %p4822_p12 = scmp.lt.s32.totalorder %s5014_s25, %s5014_s25 }
  0x33   : > { %p4815_p5 = scmp.ne.s32.totalorder %s5014_s25, %s4814_s22  ;;  %p4823_p0 = scmp.lt.s32.totalorder %s4814_s22, %s4814_s22 }
  0x35   : > { %p4817_p7 = pnand %p4815_p5, %p4775_p13  ;;  %p4824_p2 = por %p4823_p0, %p4822_p12 }
  0x37   : > { %p4818_p9 = pneg %p4817_p7 }
  0x39   : > { %p4825_p1 = pnand %p4824_p2, %p4818_p9 }
  0x3b   : > { %4828 = shalt.err (!%p4825_p1)
}
  0x3c   : > { %4144 = dma.hbm_to_vmem [thread:$0]  (!%p5010_p11), %s5477_s2, 192, %s5014_s25, [#allocation6]  }
  0x3d   : > { %s5069_s4 = sadd.s32 1, %s4929_s15   ;;  %s27_s23 = sadd.s32 1, %s4925_s14 }
  0x3e   : > { %s24_s5 = ssub.s32 %s4929_s15, %s5069_s4  ;;  %p34_p13 = scmp.ne.s32.totalorder %s4925_s14, %s4921_s13 }
  0x3f   : > { %p25_p6 = scmp.eq.s32.totalorder %s24_s5, 0  ;;  %p35_p10 = scmp.eq.s32.totalorder %s4929_s15, 0 }
  0x40   : > { %p5486_p3 = scmp.eq.s32.totalorder %s4980_s16, 1  ;;  %p4155_p7 = scmp.lt.s32.totalorder %s4929_s15, 2 }
  0x41   : > { %s5085_s7 = scalar_select %p25_p6, %s4925_s14, %s27_s23  }
  0x42   : > { %p5079_p5 = por %p5486_p3, %p34_p13  ;;  %p36_p9 = por %p35_p10, %p34_p13 }
  0x43   : > { %s156_s8 = sand.u32 1, %s4925_s14   ;;  %s4087_s25 = sshll.u32 %s4929_s15, 12 }
  0x44   : > { %s5487_s6 = scalar_select %p5079_p5, 1, 0 }
  0x45   : > { %s3691_s9 = sshll.u32 %s156_s8, 8  ;;  %s5092_s17 = scalar_lea.hbm %s5475_s0, %s4087_s25 }
  0x46   : > { %s160_s21 = scalar_lea.vmem [#allocation2], %s3691_s9  ;;  %p5096_p11 = pnand %p4155_p7, %p36_p9 }
  0x47   : > { %s168_s24 = sshll.u32 %s160_s21, 4  ;;  %s5100_s27 = scalar_lea.sflag [#allocation3], %s156_s8  ;;  %s5094_s24 = int_to_ptr.vmem [resolvable:$true] %s168_s24 }
  0x48   : > { %s4829_s28 = scalar_lea.hbm %s5092_s17, 4096  ;;  %p4831_p0 = pneg %p5096_p11 }
  0x49   : > { %p4830_p12 = scmp.ne.s32.totalorder %s5092_s17, %s4829_s28  ;;  %s4834_s30 = scalar_lea.hbm %s5475_s0, 8192 }
  0x4a   : > { %p4835_p13 = scmp.lt.u32.totalorder %s5092_s17, %s5475_s0  ;;  %p4836_p6 = scmp.lt.u32.totalorder %s4834_s30, %s4829_s28 }
  0x4b   : > { %p4832_p2 = pnand %p4831_p0, %p4830_p12  ;;  %p4838_p3 = scmp.lt.u32.totalorder %s4829_s28, %s5092_s17 }
  0x4c   : > { %p4837_p10 = por %p4836_p6, %p4835_p13 }
  0x4d   : > { %p4833_p1 = pneg %p4832_p2 }
  0x4e   : > { %p4839_p7 = por %p4838_p3, %p4837_p10 }
  0x50   : > { %p4840_p9 = pnand %p4839_p7, %p4833_p1 }
  0x52   : > { %4843 = shalt.err (!%p4840_p9)
}
  0x53   : > { %s4844_s8 = scalar_lea.vmem %s5094_s24, 4096  ;;  %s4935_s9 = smov [#allocation2]  }
  0x54   : > { %p4845_p12 = scmp.ne.s32.totalorder %s5094_s24, %s4844_s8  ;;  %s4849_s25 = sshll.u32 %s4935_s9, 4  ;;  %s4850_s25 = int_to_ptr.vmem [resolvable:$false] %s4849_s25 }
  0x55   : > { %s4851_s10 = scalar_lea.vmem %s4850_s25, 8192  ;;  %p4852_p4 = scmp.lt.s32.totalorder %s5094_s24, %s4850_s25 }
  0x56   : > { %p4847_p2 = pnand %p4845_p12, %p4831_p0  ;;  %p4853_p13 = scmp.lt.s32.totalorder %s4851_s10, %s4844_s8 }
  0x58   : > { %p4848_p5 = pneg %p4847_p2  ;;  %p4854_p6 = por %p4853_p13, %p4852_p4 }
  0x5a   : > { %p4855_p10 = pnand %p4854_p6, %p4848_p5 }
  0x5c   : > { %4858 = shalt.err (!%p4855_p10)
}
  0x5d   : > { %s4936_s11 = smov 256   ;;  %s4937_s21 = smov 16  }
  0x5e   : > { %4148 = dma.hbm_to_vmem [thread:$0]  (!%p5096_p11), %s5092_s17, 4096, %s5094_s24, %s5100_s27, %s4936_s11, %s4936_s11, %s4937_s21  }
  0x5f   : > { %180 = sbr.rel (%p4999_p8) target bundleno = 750 (0x2ee), region = 32  ;;  %s5131_s28 = sand.u32 (!%p4999_p8), 1, %s4921_s13  }
  0x60   : > { %s3696_s22 = sshll.u32 (!%p4999_p8), %s5131_s28, 8  ;;  %s183_s29 = scalar_lea.sflag (!%p4999_p8), [#allocation3], %s5131_s28 }
  0x61   : > { %s5135_s30 = scalar_lea.vmem (!%p4999_p8), [#allocation2], %s3696_s22  ;;  %p5489_p4 = scmp.ne.s32.totalorder (!%p4999_p8), %s5482_s18, 0 }
  0x66   : > { %4904 = dma.done.wait (%p5489_p4), %s183_s29, 4096  }
  0x67   : > { %4906 = vsyncadd (%p5489_p4), %s183_s29, 4294963200  ;;  %p5490_p5 = scmp.eq.s32.totalorder %s4980_s16, 0 }
  0x69   : > { %4908 = dma.done.wait (%p5490_p5), [#allocation6], 49344   ;;  %p5491_p8 = pmov %p5490_p5 }
  0x6a   : > { %v4197_v0 = vld [vmem:[#allocation5 + $0x4] ss:$48 sps:$4 sm:$0xff]   ;;  %v4199_v1 = vld [vmem:[#allocation5 + $0xc] ss:$48 sps:$4 sm:$0xff]   ;;  %v4201_v2 = vld [vmem:[#allocation5] ss:$48 sps:$4 sm:$0xff]  }
  0x6b   : > { %4910 = vsyncadd (%p5491_p8), [#allocation6], 4294917952  ;;  %3078 = vmatprep.subr.bf16.mxu0 %v4197_v0  ;;  %v4202_v3 = vld [vmem:[#allocation5 + $0x8] ss:$48 sps:$4 sm:$0xff]   ;;  %3160 = vmatprep.subr.bf16.mxu1 %v4199_v1  ;;  %v4203_v4 = vld [vmem:[#allocation5 + $0x64] ss:$48 sps:$4 sm:$0xff]  }
  0x6c   : > { %3079 = vmatpush1.bf16.msra.mxu0 %v4201_v2  ;;  %3161 = vmatpush1.bf16.msra.mxu1 %v4202_v3  ;;  %v4205_v5 = vld [vmem:[#allocation5 + $0x6c] ss:$48 sps:$4 sm:$0xff]   ;;  %v4207_v6 = vld [vmem:[#allocation5 + $0x60] ss:$48 sps:$4 sm:$0xff]   ;;  %v4208_v7 = vld [vmem:[#allocation5 + $0x68] ss:$48 sps:$4 sm:$0xff]  }
  0x6d   : > { %3080 = vmatprep.subr.bf16.mxu0 %v4203_v4  ;;  %3162 = vmatprep.subr.bf16.mxu1 %v4205_v5  ;;  %v4209_v8 = vld [vmem:[#allocation5 + $0xc4] ss:$48 sps:$4 sm:$0xff]   ;;  %v4211_v9 = vld [vmem:[#allocation5 + $0xcc] ss:$48 sps:$4 sm:$0xff]   ;;  %v4213_v10 = vld [vmem:[#allocation5 + $0xc0] ss:$48 sps:$4 sm:$0xff]  }
  0x6e   : > { %v4214_v11 = vld [vmem:[#allocation5 + $0xc8] ss:$48 sps:$4 sm:$0xff]   ;;  %v4215_v12 = vld [vmem:[#allocation5 + $0x124] ss:$48 sps:$4 sm:$0xff]   ;;  %v4217_v13 = vld [vmem:[#allocation5 + $0x12c] ss:$48 sps:$4 sm:$0xff]  }
  0x6f   : > { %v4219_v14 = vld [vmem:[#allocation5 + $0x120] ss:$48 sps:$4 sm:$0xff]   ;;  %v4220_v15 = vld [vmem:[#allocation5 + $0x128] ss:$48 sps:$4 sm:$0xff]   ;;  %v4221_v16 = vld [vmem:[#allocation5 + $0x184] ss:$48 sps:$4 sm:$0xff]  }
  0x70   : > { %3081 = vmatpush1.bf16.msra.mxu0 %v4207_v6  ;;  %3163 = vmatpush1.bf16.msra.mxu1 %v4208_v7  ;;  %v4223_v17 = vld [vmem:[#allocation5 + $0x18c] ss:$48 sps:$4 sm:$0xff]   ;;  %v4225_v18 = vld [vmem:[#allocation5 + $0x180] ss:$48 sps:$4 sm:$0xff]   ;;  %v4226_v19 = vld [vmem:[#allocation5 + $0x188] ss:$48 sps:$4 sm:$0xff]  }
  0x71   : > { %3082 = vmatprep.subr.bf16.mxu0 %v4209_v8  ;;  %3164 = vmatprep.subr.bf16.mxu1 %v4211_v9  ;;  %v4227_v20 = vld [vmem:[#allocation5 + $0x1e4] ss:$48 sps:$4 sm:$0xff]   ;;  %v4229_v21 = vld [vmem:[#allocation5 + $0x1ec] ss:$48 sps:$4 sm:$0xff]   ;;  %v4231_v22 = vld [vmem:[#allocation5 + $0x1e0] ss:$48 sps:$4 sm:$0xff]  }
  0x72   : > { %v4232_v23 = vld [vmem:[#allocation5 + $0x1e8] ss:$48 sps:$4 sm:$0xff]   ;;  %v4233_v24 = vld [vmem:[#allocation5 + $0x244] ss:$48 sps:$4 sm:$0xff]   ;;  %v4235_v25 = vld [vmem:[#allocation5 + $0x24c] ss:$48 sps:$4 sm:$0xff]  }
  0x73   : > { %v4237_v26 = vld [vmem:[#allocation5 + $0x240] ss:$48 sps:$4 sm:$0xff]   ;;  %v4238_v27 = vld [vmem:[#allocation5 + $0x248] ss:$48 sps:$4 sm:$0xff]   ;;  %v4239_v28 = vld [vmem:[#allocation5 + $0x2a4] ss:$48 sps:$4 sm:$0xff]  }
  0x74   : > { %3083 = vmatpush1.bf16.msra.mxu0 %v4213_v10  ;;  %3165 = vmatpush1.bf16.msra.mxu1 %v4214_v11  ;;  %v4241_v29 = vld [vmem:[#allocation5 + $0x2ac] ss:$48 sps:$4 sm:$0xff]   ;;  %v4243_v30 = vld [vmem:[#allocation5 + $0x2a0] ss:$48 sps:$4 sm:$0xff]   ;;  %v4244_v31 = vld [vmem:[#allocation5 + $0x2a8] ss:$48 sps:$4 sm:$0xff]  }
  0x75   : > { %3084 = vmatprep.subr.bf16.mxu0 %v4215_v12  ;;  %3166 = vmatprep.subr.bf16.mxu1 %v4217_v13  ;;  %v4245_v32 = vld [vmem:[#allocation5 + $0x304] ss:$48 sps:$4 sm:$0xff]   ;;  %v4247_v33 = vld [vmem:[#allocation5 + $0x30c] ss:$48 sps:$4 sm:$0xff]   ;;  %v4249_v34 = vld [vmem:[#allocation5 + $0x300] ss:$48 sps:$4 sm:$0xff]  }
  0x76   : > { %v4250_v35 = vld [vmem:[#allocation5 + $0x308] ss:$48 sps:$4 sm:$0xff]   ;;  %v4251_v36 = vld [vmem:[#allocation5 + $0x364] ss:$48 sps:$4 sm:$0xff]   ;;  %v4253_v37 = vld [vmem:[#allocation5 + $0x36c] ss:$48 sps:$4 sm:$0xff]  }
  0x77   : > { %v4255_v38 = vld [vmem:[#allocation5 + $0x360] ss:$48 sps:$4 sm:$0xff]   ;;  %v4256_v39 = vld [vmem:[#allocation5 + $0x368] ss:$48 sps:$4 sm:$0xff]   ;;  %v4257_v40 = vld [vmem:[#allocation5 + $0x3c4] ss:$48 sps:$4 sm:$0xff]  }
  0x78   : > { %3085 = vmatpush1.bf16.msra.mxu0 %v4219_v14  ;;  %3167 = vmatpush1.bf16.msra.mxu1 %v4220_v15  ;;  %v4259_v41 = vld [vmem:[#allocation5 + $0x3cc] ss:$48 sps:$4 sm:$0xff]   ;;  %v4261_v42 = vld [vmem:[#allocation5 + $0x3c0] ss:$48 sps:$4 sm:$0xff]   ;;  %v4262_v43 = vld [vmem:[#allocation5 + $0x3c8] ss:$48 sps:$4 sm:$0xff]  }
  0x79   : > { %3086 = vmatprep.subr.bf16.mxu0 %v4221_v16  ;;  %3168 = vmatprep.subr.bf16.mxu1 %v4223_v17  ;;  %v4263_v44 = vld [vmem:[#allocation5 + $0x424] ss:$48 sps:$4 sm:$0xff]   ;;  %v4265_v45 = vld [vmem:[#allocation5 + $0x42c] ss:$48 sps:$4 sm:$0xff]   ;;  %v4267_v46 = vld [vmem:[#allocation5 + $0x420] ss:$48 sps:$4 sm:$0xff]  }
  0x7a   : > { %v4268_v47 = vld [vmem:[#allocation5 + $0x428] ss:$48 sps:$4 sm:$0xff]   ;;  %v5146_v48 = vld [vmem:[%s5135_s30] sm:$0xff]  ;;  %v4271_v50 = vld [vmem:[#allocation5 + $0x48c] ss:$48 sps:$4 sm:$0xff]   ;;  %vm1115_vm0 = vcmask 1041409  }
  0x7b   : > { %v4269_v49 = vld [vmem:[#allocation5 + $0x484] ss:$48 sps:$4 sm:$0xff]   ;;  %v251_v54 = vunpack.c.h.bf16 %v5146_v48  ;;  %v250_v55 = vunpack.c.l.bf16 %v5146_v48  ;;  %v4273_v6 = vld [vmem:[#allocation5 + $0x480] ss:$48 sps:$4 sm:$0xff]   ;;  %v4274_v7 = vld [vmem:[#allocation5 + $0x488] ss:$48 sps:$4 sm:$0xff]  }
  0x7c   : > { %3087 = vmatpush1.bf16.msra.mxu0 %v4225_v18  ;;  %3169 = vmatpush1.bf16.msra.mxu1 %v4226_v19  ;;  %v5149_v51 = vld [vmem:[%s5135_s30 + $0x10] sm:$0xff]  ;;  %v5152_v52 = vld [vmem:[%s5135_s30 + $0x20] sm:$0xff]  ;;  %vm1117_vm1 = vcmask 1042434   ;;  %vm1119_vm2 = vcmask 1043459   ;;  %vm1121_vm3 = vcmask 1044484   ;;  %vm1123_vm4 = vcmask 1045509  }
  0x7d   : > { %3088 = vmatprep.subr.bf16.mxu0 %v4227_v20  ;;  %3170 = vmatprep.subr.bf16.mxu1 %v4229_v21  ;;  %v5155_v53 = vld [vmem:[%s5135_s30 + $0x30] sm:$0xff]  ;;  %v5160_v56 = vld [vmem:[%s5135_s30 + $0x40] sm:$0xff]  ;;  %v255_v59 = vunpack.c.h.bf16 %v5149_v51  ;;  %v259_v60 = vunpack.c.h.bf16 %v5152_v52  ;;  %v254_v62 = vunpack.c.l.bf16 %v5149_v51  ;;  %v258_v5 = vunpack.c.l.bf16 %v5152_v52  ;;  %s4124_s18 = smul.u32 96, %s5131_s28  ;;  %p5492_p0 = scmp.ne.s32.totalorder %s5487_s6, 0 }
  0x7e   : > { %v5163_v57 = vld [vmem:[%s5135_s30 + $0x50] sm:$0xff]  ;;  %v5166_v58 = vld [vmem:[%s5135_s30 + $0x60] sm:$0xff]  ;;  %v263_v61 = vunpack.c.h.bf16 %v5155_v53  ;;  %v267_v2 = vunpack.c.h.bf16 %v5160_v56  ;;  %vm1125_vm5 = vcmask 1046534   ;;  %vm1127_vm6 = vcmask 1047559   ;;  %s4125_s17 = smul.u32 1536, %s4980_s16  ;;  %s3583_s16 = scalar_lea.sflag [#allocation4], %s5131_s28 }
  0x7f   : > { %v5173_v63 = vld [vmem:[%s5135_s30 + $0x70] sm:$0xff]  ;;  %v5176_v0 = vld [vmem:[%s5135_s30 + $0x80] sm:$0xff]  ;;  %v271_v3 = vunpack.c.h.bf16 %v5163_v57  ;;  %v275_v4 = vunpack.c.h.bf16 %v5166_v58  ;;  %v321_v14 = vadd.f32 %v255_v59, %v251_v54  ;;  %s5394_s20 = scalar_lea.vmem [#allocation8], %s4124_s18  ;;  %s4938_s8 = smov [#allocation8]  }
  0x80   : > { %3089 = vmatpush1.bf16.msra.mxu0 %v4231_v22  ;;  %3171 = vmatpush1.bf16.msra.mxu1 %v4232_v23  ;;  %v5179_v1 = vld [vmem:[%s5135_s30 + $0x90] sm:$0xff]  ;;  %v5186_v8 = vld [vmem:[%s5135_s30 + $0xa0] sm:$0xff]  ;;  %v279_v11 = vunpack.c.h.bf16 %v5173_v63  ;;  %v283_v12 = vunpack.c.h.bf16 %v5176_v0  ;;  %v349_v21 = vadd.f32 %v263_v61, %v259_v60  ;;  %s3597_s24 = sshll.u32 %s5394_s20, 4  ;;  %s5427_s23 = scalar_lea.hbm %s5478_s3, %s4125_s17  ;;  %s5429_s24 = int_to_ptr.vmem [resolvable:$true] %s3597_s24 }
  0x81   : > { %3090 = vmatprep.subr.bf16.mxu0 %v4233_v24  ;;  %3172 = vmatprep.subr.bf16.mxu1 %v4235_v25  ;;  %v5189_v9 = vld [vmem:[%s5135_s30 + $0xb0] sm:$0xff]  ;;  %v5192_v10 = vld [vmem:[%s5135_s30 + $0xc0] sm:$0xff]  ;;  %v287_v13 = vunpack.c.h.bf16 %v5179_v1  ;;  %v291_v18 = vunpack.c.h.bf16 %v5186_v8  ;;  %s4859_s5 = scalar_lea.vmem %s5429_s24, 1536  ;;  %s4863_s9 = sshll.u32 %s4938_s8, 4  ;;  %s4864_s9 = int_to_ptr.vmem [resolvable:$false] %s4863_s9 }
  0x82   : > { %v5198_v15 = vld [vmem:[%s5135_s30 + $0xd0] sm:$0xff]  ;;  %v5201_v16 = vld [vmem:[%s5135_s30 + $0xe0] sm:$0xff]  ;;  %v295_v19 = vunpack.c.h.bf16 %v5189_v9  ;;  %v299_v20 = vunpack.c.h.bf16 %v5192_v10  ;;  %p4860_p11 = scmp.ne.s32.totalorder %s5429_s24, %s4859_s5  ;;  %s4865_s25 = scalar_lea.vmem %s4864_s9, 3072 }
  0x83   : > { %v5204_v17 = vld [vmem:[%s5135_s30 + $0xf0] sm:$0xff]  ;;  %v303_v23 = vunpack.c.h.bf16 %v5198_v15  ;;  %v307_v24 = vunpack.c.h.bf16 %v5201_v16  ;;  %p4866_p7 = scmp.lt.s32.totalorder %s5429_s24, %s4864_s9  ;;  %p4867_p9 = scmp.lt.s32.totalorder %s4865_s25, %s4859_s5 }
  0x84   : > { %3091 = vmatpush1.bf16.msra.mxu0 %v4237_v26  ;;  %3173 = vmatpush1.bf16.msra.mxu1 %v4238_v27  ;;  %v4275_v22 = vld [vmem:[#allocation5 + $0x4e4] ss:$48 sps:$4 sm:$0xff]   ;;  %v311_v25 = vunpack.c.h.bf16 %v5204_v17  ;;  %v322_v26 = vrot.slane %v321_v14, 4  ;;  %v4277_v27 = vld [vmem:[#allocation5 + $0x4ec] ss:$48 sps:$4 sm:$0xff]   ;;  %p4861_p1 = pnand %p4860_p11, %p5492_p0 }
  0x85   : > { %3092 = vmatprep.subr.bf16.mxu0 %v4239_v28  ;;  %3174 = vmatprep.subr.bf16.mxu1 %v4241_v29  ;;  %v350_v28 = vrot.slane %v349_v21, 4  ;;  %v377_v29 = vadd.f32 %v271_v3, %v267_v2  ;;  %p4868_p12 = por %p4867_p9, %p4866_p7 }
  0x86   : > { %p4862_p3 = pneg %p4861_p1 }
  0x88   : > { %3093 = vmatpush1.bf16.msra.mxu0 %v4243_v30  ;;  %3175 = vmatpush1.bf16.msra.mxu1 %v4244_v31  ;;  %v405_v30 = vadd.f32 %v279_v11, %v275_v4  ;;  %v433_v31 = vadd.f32 %v287_v13, %v283_v12  ;;  %v4285_v4 = vld [vmem:[#allocation5 + $0x540] ss:$48 sps:$4 sm:$0xff]   ;;  %v4286_v13 = vld [vmem:[#allocation5 + $0x548] ss:$48 sps:$4 sm:$0xff]   ;;  %p4869_p2 = pnand %p4868_p12, %p4862_p3 }
  0x89   : > { %3094 = vmatprep.subr.bf16.mxu0 %v4245_v32  ;;  %3176 = vmatprep.subr.bf16.mxu1 %v4247_v33  ;;  %v4279_v32 = vld [vmem:[#allocation5 + $0x4e0] ss:$48 sps:$4 sm:$0xff]   ;;  %v323_v33 = vadd.f32 %v322_v26, %v321_v14 }
  0x8c   : > { %3095 = vmatpush1.bf16.msra.mxu0 %v4249_v34  ;;  %3177 = vmatpush1.bf16.msra.mxu1 %v4250_v35  ;;  %v461_v34 = vadd.f32 %v295_v19, %v291_v18  ;;  %v489_v35 = vadd.f32 %v303_v23, %v299_v20 }
  0x8d   : > { %3096 = vmatprep.subr.bf16.mxu0 %v4251_v36  ;;  %3178 = vmatprep.subr.bf16.mxu1 %v4253_v37  ;;  %v517_v36 = vadd.f32 %v311_v25, %v307_v24  ;;  %v4280_v37 = vld [vmem:[#allocation5 + $0x4e8] ss:$48 sps:$4 sm:$0xff]  }
  0x90   : > { %3097 = vmatpush1.bf16.msra.mxu0 %v4255_v38  ;;  %3179 = vmatpush1.bf16.msra.mxu1 %v4256_v39  ;;  %v351_v38 = vadd.f32 %v350_v28, %v349_v21  ;;  %v378_v39 = vrot.slane %v377_v29, 4  ;;  %v4287_v21 = vld [vmem:[#allocation5 + $0x5a4] ss:$48 sps:$4 sm:$0xff]  }
  0x91   : > { %3098 = vmatprep.subr.bf16.mxu0 %v4257_v40  ;;  %3180 = vmatprep.subr.bf16.mxu1 %v4259_v41  ;;  %v406_v40 = vrot.slane %v405_v30, 4  ;;  %v434_v41 = vrot.slane %v433_v31, 4 }
  0x93   : > { %v407_v54 = vadd.f32 %v406_v40, %v405_v30  ;;  %v435_v59 = vadd.f32 %v434_v41, %v433_v31 }
  0x94   : > { %3099 = vmatpush1.bf16.msra.mxu0 %v4261_v42  ;;  %3181 = vmatpush1.bf16.msra.mxu1 %v4262_v43  ;;  %v4281_v42 = vld [vmem:[#allocation5 + $0x544] ss:$48 sps:$4 sm:$0xff]   ;;  %v324_v43 = vrot.slane %v323_v33, 2 }
  0x95   : > { %3100 = vmatprep.subr.bf16.mxu0 %v4263_v44  ;;  %3182 = vmatprep.subr.bf16.mxu1 %v4265_v45  ;;  %v462_v44 = vrot.slane %v461_v34, 4  ;;  %v490_v45 = vrot.slane %v489_v35, 4  ;;  %v436_v12 = vrot.slane %v435_v59, 2 }
  0x96   : > { %v325_v60 = vadd.f32 %v324_v43, %v323_v33 }
  0x97   : > { %v463_v61 = vadd.f32 %v462_v44, %v461_v34  ;;  %v491_v2 = vadd.f32 %v490_v45, %v489_v35  ;;  %v437_v26 = vadd.f32 %v436_v12, %v435_v59  ;;  %v4295_v45 = vld [vmem:[#allocation5 + $0x604] ss:$48 sps:$4 sm:$0xff]  }
  0x98   : > { %3101 = vmatpush1.bf16.msra.mxu0 %v4267_v46  ;;  %3183 = vmatpush1.bf16.msra.mxu1 %v4268_v47  ;;  %v518_v46 = vrot.slane %v517_v36, 4  ;;  %v4283_v47 = vld [vmem:[#allocation5 + $0x54c] ss:$48 sps:$4 sm:$0xff]   ;;  %v326_v14 = vrot.slane %v325_v60, 1 }
  0x99   : > { %3102 = vmatprep.subr.bf16.mxu0 %v4269_v49  ;;  %3184 = vmatprep.subr.bf16.mxu1 %v4271_v50  ;;  %v352_v49 = vrot.slane %v351_v38, 2  ;;  %v379_v50 = vadd.f32 %v378_v39, %v377_v29  ;;  %v464_v18 = vrot.slane %v463_v61, 2  ;;  %v492_v19 = vrot.slane %v491_v2, 2 }
  0x9a   : > { %v519_v3 = vadd.f32 %v518_v46, %v517_v36  ;;  %v327_v28 = vadd.f32 %v326_v14, %v325_v60  ;;  %v438_v36 = vrot.slane %v437_v26, 1  ;;  %v4298_v46 = vld [vmem:[#allocation5 + $0x60c] ss:$48 sps:$4 sm:$0xff]  }
  0x9b   : > { %v353_v11 = vadd.f32 %v352_v49, %v351_v38  ;;  %v465_v29 = vadd.f32 %v464_v18, %v463_v61  ;;  %v493_v30 = vadd.f32 %v492_v19, %v491_v2 }
  0x9c   : > { %3103 = vmatpush1.bf16.msra.mxu0 %v4273_v6  ;;  %3185 = vmatpush1.bf16.msra.mxu1 %v4274_v7  ;;  %v380_v6 = vrot.slane %v379_v50, 2  ;;  %v408_v7 = vrot.slane %v407_v54, 2  ;;  %v520_v20 = vrot.slane %v519_v3, 2  ;;  %v540_v40 = vmul.f32 0.0625, %v327_v28 }
  0x9d   : > { %3104 = vmatprep.subr.bf16.mxu0 %v4275_v22  ;;  %3186 = vmatprep.subr.bf16.mxu1 %v4277_v27  ;;  %v4289_v22 = vld [vmem:[#allocation5 + $0x5ac] ss:$48 sps:$4 sm:$0xff]   ;;  %v354_v23 = vrot.slane %v353_v11, 1  ;;  %v4291_v27 = vld [vmem:[#allocation5 + $0x5a0] ss:$48 sps:$4 sm:$0xff]   ;;  %v494_v38 = vrot.slane %v493_v30, 1  ;;  %v439_v43 = vadd.f32 %v438_v36, %v437_v26  ;;  %v290_v36 = vunpack.c.l.bf16 %v5186_v8 }
  0x9e   : > { %v381_v24 = vadd.f32 %v380_v6, %v379_v50  ;;  %v409_v25 = vadd.f32 %v408_v7, %v407_v54  ;;  %v521_v31 = vadd.f32 %v520_v20, %v519_v3  ;;  %v572_v54 = vpack.c.bf16 %v540_v40, %v540_v40 }
  0x9f   : > { %v355_v33 = vadd.f32 %v354_v23, %v353_v11  ;;  %v495_v49 = vadd.f32 %v494_v38, %v493_v30  ;;  %v556_v61 = vmul.f32 0.0625, %v439_v43  ;;  %v298_v38 = vunpack.c.l.bf16 %v5192_v10 }
  0xa0   : > { %3105 = vmatpush1.bf16.msra.mxu0 %v4279_v32  ;;  %3187 = vmatpush1.bf16.msra.mxu1 %v4280_v37  ;;  %v4292_v32 = vld [vmem:[#allocation5 + $0x5a8] ss:$48 sps:$4 sm:$0xff]   ;;  %v382_v34 = vrot.slane %v381_v24, 1  ;;  %v410_v35 = vrot.slane %v409_v25, 1  ;;  %v466_v37 = vrot.slane %v465_v29, 1  ;;  %v522_v39 = vrot.slane %v521_v31, 1 }
  0xa1   : > { %3106 = vmatprep.subr.bf16.mxu0 %v4281_v42  ;;  %3188 = vmatprep.subr.bf16.mxu1 %v4283_v47  ;;  %v544_v44 = vmul.f32 0.0625, %v355_v33  ;;  %v1084_v6 = vunpack.c.l.b16 %v572_v54  ;;  %v278_v33 = vunpack.c.l.bf16 %v5173_v63  ;;  %v306_v63 = vunpack.c.l.bf16 %v5201_v16 }
  0xa2   : > { %v383_v41 = vadd.f32 %v382_v34, %v381_v24  ;;  %v411_v42 = vadd.f32 %v410_v35, %v409_v25  ;;  %v467_v47 = vadd.f32 %v466_v37, %v465_v29  ;;  %v523_v50 = vadd.f32 %v522_v39, %v521_v31 }
  0xa3   : > { %v576_v2 = vpack.c.bf16 %v544_v44, %v544_v44  ;;  %v266_v29 = vunpack.c.l.bf16 %v5160_v56  ;;  %v270_v31 = vunpack.c.l.bf16 %v5163_v57  ;;  %v282_v34 = vunpack.c.l.bf16 %v5176_v0 }
  0xa4   : > { %3107 = vmatpush1.bf16.msra.mxu0 %v4285_v4  ;;  %3189 = vmatpush1.bf16.msra.mxu1 %v4286_v13  ;;  %v548_v59 = vmul.f32 0.0625, %v383_v41  ;;  %v552_v60 = vmul.f32 0.0625, %v411_v42  ;;  %v560_v3 = vmul.f32 0.0625, %v467_v47  ;;  %v564_v4 = vmul.f32 0.0625, %v495_v49 }
  0xa5   : > { %3108 = vmatprep.subr.bf16.mxu0 %v4287_v21  ;;  %3190 = vmatprep.subr.bf16.mxu1 %v4289_v22  ;;  %v568_v11 = vmul.f32 0.0625, %v523_v50  ;;  %v588_v13 = vpack.c.bf16 %v556_v61, %v556_v61  ;;  %v1088_v14 = vunpack.c.l.b16 %v576_v2  ;;  %v262_v21 = vunpack.c.l.bf16 %v5155_v53 }
  0xa6   : > { %v580_v7 = vpack.c.bf16 %v548_v59, %v548_v59  ;;  %v584_v12 = vpack.c.bf16 %v552_v60, %v552_v60  ;;  %v592_v18 = vpack.c.bf16 %v560_v3, %v560_v3  ;;  %v596_v19 = vpack.c.bf16 %v564_v4, %v564_v4 }
  0xa7   : > { %v600_v20 = vpack.c.bf16 %v568_v11, %v568_v11  ;;  %v1100_v24 = vunpack.c.l.b16 %v588_v13  ;;  %v1129_v25 = vsel %vm1115_vm0, %v1088_v14, %v1084_v6  ;;  %v286_v35 = vunpack.c.l.bf16 %v5179_v1 }
  0xa8   : > { %3109 = vmatpush1.bf16.msra.mxu0 %v4291_v27  ;;  %3191 = vmatpush1.bf16.msra.mxu1 %v4292_v32  ;;  %v1092_v22 = vunpack.c.l.b16 %v580_v7  ;;  %v1096_v23 = vunpack.c.l.b16 %v584_v12  ;;  %v1104_v26 = vunpack.c.l.b16 %v592_v18  ;;  %v1108_v27 = vunpack.c.l.b16 %v596_v19 }
  0xa9   : > { %3119 = vmatprep.subr.bf16.mxu0 %v4295_v45  ;;  %3201 = vmatprep.subr.bf16.mxu1 %v4298_v46  ;;  %v1112_v28 = vunpack.c.l.b16 %v600_v20  ;;  %v274_v32 = vunpack.c.l.bf16 %v5166_v58  ;;  %v294_v56 = vunpack.c.l.bf16 %v5189_v9  ;;  %v302_v57 = vunpack.c.l.bf16 %v5198_v15 }
  0xaa   : > { %v1130_v30 = vsel %vm1117_vm1, %v1092_v22, %v1129_v25  ;;  %v310_v39 = vunpack.c.l.bf16 %v5204_v17  ;;  %v314_v0 = vadd.f32 %v254_v62, %v250_v55  ;;  %v342_v8 = vadd.f32 %v262_v21, %v258_v5 }
  0xab   : > { %v1131_v53 = vsel %vm1119_vm2, %v1096_v23, %v1130_v30  ;;  %v370_v9 = vadd.f32 %v270_v31, %v266_v29  ;;  %v398_v10 = vadd.f32 %v278_v33, %v274_v32  ;;  %v426_v41 = vadd.f32 %v286_v35, %v282_v34 }
  0xac   : > { %v1132_v37 = vsel %vm1121_vm3, %v1100_v24, %v1131_v53  ;;  %v315_v40 = vrot.slane %v314_v0, 4  ;;  %v454_v42 = vadd.f32 %v294_v56, %v290_v36  ;;  %v343_v17 = vrot.slane %v342_v8, 4 }
  0xad   : > { %v1133_v58 = vsel %vm1123_vm4, %v1104_v26, %v1132_v37  ;;  %v371_v43 = vrot.slane %v370_v9, 4  ;;  %v399_v48 = vrot.slane %v398_v10, 4  ;;  %v427_v51 = vrot.slane %v426_v41, 4 }
  0xae   : > { %v1134_v1 = vsel %vm1125_vm5, %v1108_v27, %v1133_v58  ;;  %v316_v44 = vadd.f32 %v315_v40, %v314_v0  ;;  %v455_v55 = vrot.slane %v454_v42, 4  ;;  %v482_v62 = vadd.f32 %v302_v57, %v298_v38 }
  0xaf   : > { %v1135_v15 = vsel %vm1127_vm6, %v1112_v28, %v1134_v1  ;;  %v344_v52 = vadd.f32 %v343_v17, %v342_v8  ;;  %v372_v5 = vadd.f32 %v371_v43, %v370_v9  ;;  %v400_v45 = vadd.f32 %v399_v48, %v398_v10 }
  0xb0   : > { %v5238_v16 = vpack.c.b16 %v1135_v15, %v1135_v15  ;;  %v317_v46 = vrot.slane %v316_v44, 2  ;;  %v428_v47 = vadd.f32 %v427_v51, %v426_v41  ;;  %v456_v49 = vadd.f32 %v455_v55, %v454_v42 }
  0xb1   : > { %v483_v50 = vrot.slane %v482_v62, 4  ;;  %v345_v54 = vrot.slane %v344_v52, 2  ;;  %v373_v59 = vrot.slane %v372_v5, 2  ;;  %v401_v60 = vrot.slane %v400_v45, 2 }
  0xb2   : > { %3110 = vmatprep.mubr.bf16.mxu0 %v5238_v16  ;;  %3192 = vmatprep.mubr.bf16.mxu1 %v5238_v16  ;;  %v510_v61 = vadd.f32 %v310_v39, %v306_v63  ;;  %v318_v2 = vadd.f32 %v317_v46, %v316_v44  ;;  %v429_v3 = vrot.slane %v428_v47, 2  ;;  %v457_v4 = vrot.slane %v456_v49, 2 }
  0xb3   : > { %v484_v11 = vadd.f32 %v483_v50, %v482_v62  ;;  %v346_v6 = vadd.f32 %v345_v54, %v344_v52  ;;  %v374_v7 = vadd.f32 %v373_v59, %v372_v5  ;;  %v402_v12 = vadd.f32 %v401_v60, %v400_v45  ;;  %v5250_v54 = vld [vmem:[%s5135_s30 + $0x18] sm:$0xff]  ;;  %v5253_v59 = vld [vmem:[%s5135_s30 + $0x28] sm:$0xff] }
  0xb4   : > { %v511_v13 = vrot.slane %v510_v61, 4  ;;  %v319_v14 = vrot.slane %v318_v2, 1  ;;  %v430_v18 = vadd.f32 %v429_v3, %v428_v47  ;;  %v458_v19 = vadd.f32 %v457_v4, %v456_v49  ;;  %v5246_v49 = vld [vmem:[%s5135_s30 + $0x8] sm:$0xff]  ;;  %v5256_v60 = vld [vmem:[%s5135_s30 + $0x38] sm:$0xff] }
  0xb5   : > { %v485_v20 = vrot.slane %v484_v11, 2  ;;  %v347_v21 = vrot.slane %v346_v6, 1  ;;  %v375_v22 = vrot.slane %v374_v7, 1  ;;  %v403_v23 = vrot.slane %v402_v12, 1  ;;  %v4296_v3 = vld [vmem:[#allocation5 + $0x608] ss:$48 sps:$4 sm:$0xff]  }
  0xb6   : > { %v512_v24 = vadd.f32 %v511_v13, %v510_v61  ;;  %v320_v25 = vadd.f32 %v319_v14, %v318_v2  ;;  %v431_v26 = vrot.slane %v430_v18, 1  ;;  %v459_v27 = vrot.slane %v458_v19, 1  ;;  %v4293_v2 = vld [vmem:[#allocation5 + $0x600] ss:$48 sps:$4 sm:$0xff]  }
  0xb7   : > { %v486_v28 = vadd.f32 %v485_v20, %v484_v11  ;;  %v348_v29 = vadd.f32 %v347_v21, %v346_v6  ;;  %v376_v30 = vadd.f32 %v375_v22, %v374_v7  ;;  %v404_v31 = vadd.f32 %v403_v23, %v402_v12  ;;  %v5261_v6 = vld [vmem:[%s5135_s30 + $0x48] sm:$0xff]  ;;  %v5264_v7 = vld [vmem:[%s5135_s30 + $0x58] sm:$0xff] }
  0xb8   : > { %v513_v32 = vrot.slane %v512_v24, 2  ;;  %v432_v33 = vadd.f32 %v431_v26, %v430_v18  ;;  %v460_v53 = vadd.f32 %v459_v27, %v458_v19  ;;  %v539_v35 = vmul.f32 0.0625, %v320_v25  ;;  %v5267_v12 = vld [vmem:[%s5135_s30 + $0x68] sm:$0xff]  ;;  %v4301_v19 = vld [vmem:[#allocation5 + $0x664] ss:$48 sps:$4 sm:$0xff]   ;;  %v5273_v21 = vld [vmem:[%s5135_s30 + $0x78] sm:$0xff] }
  0xb9   : > { %v487_v34 = vrot.slane %v486_v28, 1  ;;  %v543_v37 = vmul.f32 0.0625, %v348_v29  ;;  %v547_v56 = vmul.f32 0.0625, %v376_v30  ;;  %v551_v38 = vmul.f32 0.0625, %v404_v31  ;;  %v4304_v20 = vld [vmem:[#allocation5 + $0x66c] ss:$48 sps:$4 sm:$0xff]  }
  0xba   : > { %v514_v36 = vadd.f32 %v513_v32, %v512_v24  ;;  %v555_v58 = vmul.f32 0.0625, %v432_v33  ;;  %v559_v63 = vmul.f32 0.0625, %v460_v53  ;;  %v571_v39 = vpack.c.bf16 %v539_v35, %v539_v35  ;;  %v5276_v22 = vld [vmem:[%s5135_s30 + $0x88] sm:$0xff]  ;;  %v5279_v23 = vld [vmem:[%s5135_s30 + $0x98] sm:$0xff] }
  0xbb   : > { %v488_v57 = vadd.f32 %v487_v34, %v486_v28  ;;  %v575_v1 = vpack.c.bf16 %v543_v37, %v543_v37  ;;  %v579_v8 = vpack.c.bf16 %v547_v56, %v547_v56  ;;  %v583_v9 = vpack.c.bf16 %v551_v38, %v551_v38  ;;  %v5286_v28 = vld [vmem:[%s5135_s30 + $0xa8] sm:$0xff]  ;;  %v5289_v29 = vld [vmem:[%s5135_s30 + $0xb8] sm:$0xff] }
  0xbc   : > { %v515_v0 = vrot.slane %v514_v36, 1  ;;  %v587_v15 = vpack.c.bf16 %v555_v58, %v555_v58  ;;  %v591_v40 = vpack.c.bf16 %v559_v63, %v559_v63  ;;  %v1083_v41 = vunpack.c.l.b16 %v571_v39  ;;  %v5292_v30 = vld [vmem:[%s5135_s30 + $0xc8] sm:$0xff]  ;;  %v5300_v34 = vld [vmem:[%s5135_s30 + $0xd8] sm:$0xff] }
  0xbd   : > { %v563_v10 = vmul.f32 0.0625, %v488_v57  ;;  %v1087_v17 = vunpack.c.l.b16 %v575_v1  ;;  %v1091_v43 = vunpack.c.l.b16 %v579_v8  ;;  %v1095_v48 = vunpack.c.l.b16 %v583_v9  ;;  %v5303_v35 = vld [vmem:[%s5135_s30 + $0xe8] sm:$0xff] }
  0xbe   : > { %v516_v42 = vadd.f32 %v515_v0, %v514_v36  ;;  %v1099_v51 = vunpack.c.l.b16 %v587_v15  ;;  %v1103_v62 = vunpack.c.l.b16 %v591_v40  ;;  %v253_v61 = vunpack.c.h.bf16 %v5246_v49  ;;  %v5306_v36 = vld [vmem:[%s5135_s30 + $0xf8] sm:$0xff]  ;;  %v4299_v0 = vld [vmem:[#allocation5 + $0x660] ss:$48 sps:$4 sm:$0xff]   ;;  %v4307_v40 = vld [vmem:[#allocation5 + $0x6c4] ss:$48 sps:$4 sm:$0xff]  }
  0xbf   : > { %v595_v44 = vpack.c.bf16 %v563_v10, %v563_v10  ;;  %v1116_v52 = vsel %vm1115_vm0, %v1087_v17, %v1083_v41  ;;  %v257_v13 = vunpack.c.h.bf16 %v5250_v54  ;;  %v261_v14 = vunpack.c.h.bf16 %v5253_v59  ;;  %v4302_v15 = vld [vmem:[#allocation5 + $0x668] ss:$48 sps:$4 sm:$0xff]  }
  0xc0   : > { %v567_v55 = vmul.f32 0.0625, %v516_v42  ;;  %v1118_v45 = vsel %vm1117_vm1, %v1091_v43, %v1116_v52  ;;  %v265_v24 = vunpack.c.h.bf16 %v5256_v60  ;;  %v269_v25 = vunpack.c.h.bf16 %v5261_v6 }
  0xc1   : > { %v1107_v5 = vunpack.c.l.b16 %v595_v44  ;;  %v1120_v47 = vsel %vm1119_vm2, %v1095_v48, %v1118_v45  ;;  %v273_v26 = vunpack.c.h.bf16 %v5264_v7  ;;  %v277_v31 = vunpack.c.h.bf16 %v5267_v12  ;;  %v4310_v48 = vld [vmem:[#allocation5 + $0x6cc] ss:$48 sps:$4 sm:$0xff]  }
  0xc2   : > { %v599_v46 = vpack.c.bf16 %v567_v55, %v567_v55  ;;  %v1122_v50 = vsel %vm1121_vm3, %v1099_v51, %v1120_v47  ;;  %v281_v32 = vunpack.c.h.bf16 %v5273_v21  ;;  %v285_v33 = vunpack.c.h.bf16 %v5276_v22  ;;  %v4305_v47 = vld [vmem:[#allocation5 + $0x6c0] ss:$48 sps:$4 sm:$0xff]  }
  0xc3   : > { %v1124_v11 = vsel %vm1123_vm4, %v1103_v62, %v1122_v50  ;;  %v289_v37 = vunpack.c.h.bf16 %v5279_v23  ;;  %v293_v56 = vunpack.c.h.bf16 %v5286_v28  ;;  %v297_v38 = vunpack.c.h.bf16 %v5289_v29  ;;  %v4308_v50 = vld [vmem:[#allocation5 + $0x6c8] ss:$48 sps:$4 sm:$0xff]  }
  0xc4   : > { %v1111_v4 = vunpack.c.l.b16 %v599_v46  ;;  %v1126_v18 = vsel %vm1125_vm5, %v1107_v5, %v1124_v11  ;;  %v301_v57 = vunpack.c.h.bf16 %v5292_v30  ;;  %v305_v58 = vunpack.c.h.bf16 %v5300_v34  ;;  %v4313_v11 = vld [vmem:[#allocation5 + $0x724] ss:$48 sps:$4 sm:$0xff]  }
  0xc5   : > { %v309_v63 = vunpack.c.h.bf16 %v5303_v35  ;;  %v313_v39 = vunpack.c.h.bf16 %v5306_v36  ;;  %v335_v1 = vadd.f32 %v257_v13, %v253_v61  ;;  %v363_v8 = vadd.f32 %v265_v24, %v261_v14 }
  0xc6   : > { %v1128_v27 = vsel %vm1127_vm6, %v1111_v4, %v1126_v18  ;;  %v391_v9 = vadd.f32 %v273_v26, %v269_v25  ;;  %v252_v10 = vunpack.c.l.bf16 %v5246_v49  ;;  %v419_v41 = vadd.f32 %v281_v32, %v277_v31 }
  0xc7   : > { %v5297_v53 = vpack.c.b16 %v1128_v27, %v1128_v27  ;;  %v447_v42 = vadd.f32 %v289_v37, %v285_v33  ;;  %v475_v17 = vadd.f32 %v297_v38, %v293_v56  ;;  %v256_v43 = vunpack.c.l.bf16 %v5250_v54  ;;  %v4311_v56 = vld [vmem:[#allocation5 + $0x720] ss:$48 sps:$4 sm:$0xff]  }
  0xc8   : > { %v336_v44 = vrot.slane %v335_v1, 4  ;;  %v364_v51 = vrot.slane %v363_v8, 4  ;;  %v392_v55 = vrot.slane %v391_v9, 4  ;;  %v503_v62 = vadd.f32 %v305_v58, %v301_v57 }
  0xc9   : > { %3111 = vmatmul.mubr.bf16.vlgmr.msra.gmra.mrb[0].mxu0 %v5297_v53  ;;  %3193 = vmatmul.mubr.bf16.vlgmr.msra.gmra.mrb[0].mxu1 %v5297_v53  ;;  %v420_v52 = vrot.slane %v419_v41, 4  ;;  %v448_v5 = vrot.slane %v447_v42, 4  ;;  %v476_v45 = vrot.slane %v475_v17, 4  ;;  %v531_v46 = vadd.f32 %v313_v39, %v309_v63  ;;  %v4314_v39 = vld [vmem:[#allocation5 + $0x728] ss:$48 sps:$4 sm:$0xff]  }
  0xca   : > { %3120 = vmatpush1.bf16.msra.mxu0 %v4293_v2  ;;  %3202 = vmatpush1.bf16.msra.mxu1 %v4296_v3  ;;  %v337_v61 = vadd.f32 %v336_v44, %v335_v1  ;;  %v365_v2 = vadd.f32 %v364_v51, %v363_v8  ;;  %v393_v3 = vadd.f32 %v392_v55, %v391_v9  ;;  %v504_v4 = vrot.slane %v503_v62, 4 }
  0xcb   : > { %3121 = vmatprep.subr.bf16.mxu0 %v4301_v19  ;;  %3203 = vmatprep.subr.bf16.mxu1 %v4304_v20  ;;  %v421_v13 = vadd.f32 %v420_v52, %v419_v41  ;;  %v449_v14 = vadd.f32 %v448_v5, %v447_v42  ;;  %v477_v18 = vadd.f32 %v476_v45, %v475_v17  ;;  %v532_v19 = vrot.slane %v531_v46, 4  ;;  %v4316_v20 = vld [vmem:[#allocation5 + $0x72c] ss:$48 sps:$4 sm:$0xff]   ;;  %v4317_v52 = vld [vmem:[#allocation5 + $0x780] ss:$48 sps:$4 sm:$0xff]  }
  0xcc   : > { %v338_v24 = vrot.slane %v337_v61, 2  ;;  %v366_v25 = vrot.slane %v365_v2, 2  ;;  %v394_v26 = vrot.slane %v393_v3, 2  ;;  %v505_v27 = vadd.f32 %v504_v4, %v503_v62  ;;  %v4320_v5 = vld [vmem:[#allocation5 + $0x788] ss:$48 sps:$4 sm:$0xff]  }
  0xcd   : > { %v422_v31 = vrot.slane %v421_v13, 2  ;;  %v450_v32 = vrot.slane %v449_v14, 2  ;;  %v478_v33 = vrot.slane %v477_v18, 2  ;;  %v533_v37 = vadd.f32 %v532_v19, %v531_v46 }
  0xce   : > { %3122 = vmatpush1.bf16.msra.mxu0 %v4299_v0  ;;  %3204 = vmatpush1.bf16.msra.mxu1 %v4302_v15  ;;  %v339_v38 = vadd.f32 %v338_v24, %v337_v61  ;;  %v367_v57 = vadd.f32 %v366_v25, %v365_v2  ;;  %v395_v58 = vadd.f32 %v394_v26, %v393_v3  ;;  %v506_v63 = vrot.slane %v505_v27, 2  ;;  %v4319_v0 = vld [vmem:[#allocation5 + $0x784] ss:$48 sps:$4 sm:$0xff]  }
  0xcf   : > { %3123 = vmatprep.subr.bf16.mxu0 %v4307_v40  ;;  %3205 = vmatprep.subr.bf16.mxu1 %v4310_v48  ;;  %v423_v1 = vadd.f32 %v422_v31, %v421_v13  ;;  %v451_v8 = vadd.f32 %v450_v32, %v449_v14  ;;  %v479_v9 = vadd.f32 %v478_v33, %v477_v18  ;;  %v534_v15 = vrot.slane %v533_v37, 2  ;;  %v4322_v40 = vld [vmem:[#allocation5 + $0x78c] ss:$48 sps:$4 sm:$0xff]   ;;  %v4325_v61 = vld [vmem:[#allocation5 + $0x7e4] ss:$48 sps:$4 sm:$0xff]  }
  0xd0   : > { %v340_v41 = vrot.slane %v339_v38, 1  ;;  %v368_v42 = vrot.slane %v367_v57, 1  ;;  %v396_v17 = vrot.slane %v395_v58, 1  ;;  %v507_v48 = vadd.f32 %v506_v63, %v505_v27  ;;  %v4328_v13 = vld [vmem:[#allocation5 + $0x7ec] ss:$48 sps:$4 sm:$0xff]  }
  0xd1   : > { %v424_v44 = vrot.slane %v423_v1, 1  ;;  %v452_v51 = vrot.slane %v451_v8, 1  ;;  %v480_v55 = vrot.slane %v479_v9, 1  ;;  %v535_v62 = vadd.f32 %v534_v15, %v533_v37 }
  0xd2   : > { %3124 = vmatpush1.bf16.msra.mxu0 %v4305_v47  ;;  %3206 = vmatpush1.bf16.msra.mxu1 %v4308_v50  ;;  %v341_v45 = vadd.f32 %v340_v41, %v339_v38  ;;  %v369_v46 = vadd.f32 %v368_v42, %v367_v57  ;;  %v397_v47 = vadd.f32 %v396_v17, %v395_v58  ;;  %v508_v50 = vrot.slane %v507_v48, 1  ;;  %v4326_v38 = vld [vmem:[#allocation5 + $0x7e8] ss:$48 sps:$4 sm:$0xff]  }
  0xd3   : > { %3125 = vmatprep.subr.bf16.mxu0 %v4313_v11  ;;  %3207 = vmatprep.subr.bf16.mxu1 %v4316_v20  ;;  %v425_v2 = vadd.f32 %v424_v44, %v423_v1  ;;  %v453_v3 = vadd.f32 %v452_v51, %v451_v8  ;;  %v481_v4 = vadd.f32 %v480_v55, %v479_v9  ;;  %v536_v11 = vrot.slane %v535_v62, 1  ;;  %v4334_v1 = vld [vmem:[#allocation5 + $0x84c] ss:$48 sps:$4 sm:$0xff]  }
  0xd4   : > { %v509_v14 = vadd.f32 %v508_v50, %v507_v48  ;;  %v542_v18 = vmul.f32 0.0625, %v341_v45  ;;  %v546_v19 = vmul.f32 0.0625, %v369_v46  ;;  %v550_v20 = vmul.f32 0.0625, %v397_v47 }
  0xd5   : > { %v537_v24 = vadd.f32 %v536_v11, %v535_v62  ;;  %v554_v25 = vmul.f32 0.0625, %v425_v2  ;;  %v558_v26 = vmul.f32 0.0625, %v453_v3  ;;  %v562_v27 = vmul.f32 0.0625, %v481_v4 }
  0xd6   : > { %3126 = vmatpush1.bf16.msra.mxu0 %v4311_v56  ;;  %3208 = vmatpush1.bf16.msra.mxu1 %v4314_v39  ;;  %v566_v31 = vmul.f32 0.0625, %v509_v14  ;;  %v574_v32 = vpack.c.bf16 %v542_v18, %v542_v18  ;;  %v578_v33 = vpack.c.bf16 %v546_v19, %v546_v19  ;;  %v582_v37 = vpack.c.bf16 %v550_v20, %v550_v20  ;;  %v4323_v56 = vld [vmem:[#allocation5 + $0x7e0] ss:$48 sps:$4 sm:$0xff]  }
  0xd7   : > { %3127 = vmatprep.subr.bf16.mxu0 %v4319_v0  ;;  %3209 = vmatprep.subr.bf16.mxu1 %v4322_v40  ;;  %v570_v57 = vmul.f32 0.0625, %v537_v24  ;;  %v586_v58 = vpack.c.bf16 %v554_v25, %v554_v25  ;;  %v590_v63 = vpack.c.bf16 %v558_v26, %v558_v26  ;;  %v594_v39 = vpack.c.bf16 %v562_v27, %v562_v27  ;;  %v4331_v0 = vld [vmem:[#allocation5 + $0x844] ss:$48 sps:$4 sm:$0xff]  }
  0xd8   : > { %v598_v8 = vpack.c.bf16 %v566_v31, %v566_v31  ;;  %v1086_v9 = vunpack.c.l.b16 %v574_v32  ;;  %v1090_v15 = vunpack.c.l.b16 %v578_v33  ;;  %v1094_v40 = vunpack.c.l.b16 %v582_v37 }
  0xd9   : > { %v602_v41 = vpack.c.bf16 %v570_v57, %v570_v57  ;;  %v1098_v42 = vunpack.c.l.b16 %v586_v58  ;;  %v1102_v17 = vunpack.c.l.b16 %v590_v63  ;;  %v260_v48 = vunpack.c.l.bf16 %v5253_v59  ;;  %v4337_v59 = vld [vmem:[#allocation5 + $0x8a4] ss:$48 sps:$4 sm:$0xff]   ;;  %v4352_v63 = vld [vmem:[#allocation5 + $0x96c] ss:$48 sps:$4 sm:$0xff]  }
  0xda   : > { %3128 = vmatpush1.bf16.msra.mxu0 %v4317_v52  ;;  %3210 = vmatpush1.bf16.msra.mxu1 %v4320_v5  ;;  %v1106_v44 = vunpack.c.l.b16 %v594_v39  ;;  %v1110_v51 = vunpack.c.l.b16 %v598_v8  ;;  %v1143_v55 = vsel %vm1115_vm0, %v1090_v15, %v1086_v9  ;;  %v264_v62 = vunpack.c.l.bf16 %v5256_v60  ;;  %v4329_v52 = vld [vmem:[#allocation5 + $0x840] ss:$48 sps:$4 sm:$0xff]   ;;  %v4332_v5 = vld [vmem:[#allocation5 + $0x848] ss:$48 sps:$4 sm:$0xff]  }
  0xdb   : > { %3129 = vmatprep.subr.bf16.mxu0 %v4325_v61  ;;  %3211 = vmatprep.subr.bf16.mxu1 %v4328_v13  ;;  %v1114_v45 = vunpack.c.l.b16 %v602_v41  ;;  %v1144_v46 = vsel %vm1117_vm1, %v1094_v40, %v1143_v55  ;;  %v268_v47 = vunpack.c.l.bf16 %v5261_v6  ;;  %v272_v50 = vunpack.c.l.bf16 %v5264_v7  ;;  %v4340_v61 = vld [vmem:[#allocation5 + $0x8ac] ss:$48 sps:$4 sm:$0xff]  }
  0xdc   : > { %v1145_v2 = vsel %vm1119_vm2, %v1098_v42, %v1144_v46  ;;  %v276_v3 = vunpack.c.l.bf16 %v5267_v12  ;;  %v280_v60 = vunpack.c.l.bf16 %v5273_v21  ;;  %v284_v4 = vunpack.c.l.bf16 %v5276_v22  ;;  %v4335_v21 = vld [vmem:[#allocation5 + $0x8a0] ss:$48 sps:$4 sm:$0xff]   ;;  %v4338_v22 = vld [vmem:[#allocation5 + $0x8a8] ss:$48 sps:$4 sm:$0xff]  }
  0xdd   : > { %v1146_v11 = vsel %vm1121_vm3, %v1102_v17, %v1145_v2  ;;  %v288_v13 = vunpack.c.l.bf16 %v5279_v23  ;;  %v292_v6 = vunpack.c.l.bf16 %v5286_v28  ;;  %v296_v7 = vunpack.c.l.bf16 %v5289_v29  ;;  %v4347_v42 = vld [vmem:[#allocation5 + $0x960] ss:$48 sps:$4 sm:$0xff]   ;;  %v4350_v17 = vld [vmem:[#allocation5 + $0x968] ss:$48 sps:$4 sm:$0xff]  }
  0xde   : > { %3130 = vmatpush1.bf16.msra.mxu0 %v4323_v56  ;;  %3212 = vmatpush1.bf16.msra.mxu1 %v4326_v38  ;;  %v1147_v14 = vsel %vm1123_vm4, %v1106_v44, %v1146_v11  ;;  %v300_v18 = vunpack.c.l.bf16 %v5292_v30  ;;  %v304_v19 = vunpack.c.l.bf16 %v5300_v34  ;;  %v308_v12 = vunpack.c.l.bf16 %v5303_v35  ;;  %v4343_v30 = vld [vmem:[#allocation5 + $0x904] ss:$48 sps:$4 sm:$0xff]   ;;  %v4346_v34 = vld [vmem:[#allocation5 + $0x90c] ss:$48 sps:$4 sm:$0xff]  }
  0xdf   : > { %3131 = vmatprep.subr.bf16.mxu0 %v4331_v0  ;;  %3213 = vmatprep.subr.bf16.mxu1 %v4334_v1  ;;  %v1148_v20 = vsel %vm1125_vm5, %v1110_v51, %v1147_v14  ;;  %v312_v23 = vunpack.c.l.bf16 %v5306_v36  ;;  %v328_v28 = vadd.f32 %v256_v43, %v252_v10  ;;  %v356_v29 = vadd.f32 %v264_v62, %v260_v48  ;;  %v4341_v36 = vld [vmem:[#allocation5 + $0x900] ss:$48 sps:$4 sm:$0xff]   ;;  %v4344_v10 = vld [vmem:[#allocation5 + $0x908] ss:$48 sps:$4 sm:$0xff]   ;;  %v4349_v43 = vld [vmem:[#allocation5 + $0x964] ss:$48 sps:$4 sm:$0xff]  }
  0xe0   : > { %v1149_v35 = vsel %vm1127_vm6, %v1114_v45, %v1148_v20  ;;  %v384_v24 = vadd.f32 %v272_v50, %v268_v47  ;;  %v412_v25 = vadd.f32 %v280_v60, %v276_v3  ;;  %v440_v32 = vadd.f32 %v288_v13, %v284_v4  ;;  %v4355_v62 = vld [vmem:[#allocation5 + $0x9c4] ss:$48 sps:$4 sm:$0xff]   ;;  %v4358_v47 = vld [vmem:[#allocation5 + $0x9cc] ss:$48 sps:$4 sm:$0xff]  }
  0xe1   : > { %v5344_v26 = vpack.c.b16 %v1149_v35, %v1149_v35  ;;  %v329_v27 = vrot.slane %v328_v28, 4  ;;  %v357_v31 = vrot.slane %v356_v29, 4  ;;  %v468_v37 = vadd.f32 %v296_v7, %v292_v6 }
  0xe2   : > { %3132 = vmatpush1.bf16.msra.mxu0 %v4329_v52  ;;  %3214 = vmatpush1.bf16.msra.mxu1 %v4332_v5  ;;  %v385_v33 = vrot.slane %v384_v24, 4  ;;  %v413_v49 = vrot.slane %v412_v25, 4  ;;  %v496_v54 = vadd.f32 %v304_v19, %v300_v18  ;;  %v441_v57 = vrot.slane %v440_v32, 4  ;;  %v4353_v18 = vld [vmem:[#allocation5 + $0x9c0] ss:$48 sps:$4 sm:$0xff]  }
  0xe3   : > { %3133 = vmatprep.subr.bf16.mxu0 %v4337_v59  ;;  %3215 = vmatprep.subr.bf16.mxu1 %v4340_v61  ;;  %v330_v56 = vadd.f32 %v329_v27, %v328_v28  ;;  %v358_v38 = vadd.f32 %v357_v31, %v356_v29  ;;  %v524_v58 = vadd.f32 %v312_v23, %v308_v12  ;;  %v469_v1 = vrot.slane %v468_v37, 4  ;;  %v4356_v19 = vld [vmem:[#allocation5 + $0x9c8] ss:$48 sps:$4 sm:$0xff]   ;;  %v4361_v23 = vld [vmem:[#allocation5 + $0xa24] ss:$48 sps:$4 sm:$0xff]  }
  0xe4   : > { %v386_v39 = vadd.f32 %v385_v33, %v384_v24  ;;  %v414_v0 = vadd.f32 %v413_v49, %v412_v25  ;;  %v497_v8 = vrot.slane %v496_v54, 4  ;;  %3151 = vmatprep.mubr.bf16.mxu0 %v5344_v26  ;;  %3233 = vmatprep.mubr.bf16.mxu1 %v5344_v26  ;;  %v442_v40 = vadd.f32 %v441_v57, %v440_v32  ;;  %v4364_v28 = vld [vmem:[#allocation5 + $0xa2c] ss:$48 sps:$4 sm:$0xff]   ;;  %v4359_v32 = vld [vmem:[#allocation5 + $0xa20] ss:$48 sps:$4 sm:$0xff]  }
  0xe5   : > { %v331_v9 = vrot.slane %v330_v56, 2  ;;  %v359_v15 = vrot.slane %v358_v38, 2  ;;  %v525_v41 = vrot.slane %v524_v58, 4  ;;  %v470_v51 = vadd.f32 %v469_v1, %v468_v37 }
  0xe6   : > { %3134 = vmatpush1.bf16.msra.mxu0 %v4335_v21  ;;  %3216 = vmatpush1.bf16.msra.mxu1 %v4338_v22  ;;  %v387_v48 = vrot.slane %v386_v39, 2  ;;  %v415_v44 = vrot.slane %v414_v0, 2  ;;  %v498_v55 = vadd.f32 %v497_v8, %v496_v54  ;;  %v443_v45 = vrot.slane %v442_v40, 2  ;;  %v4362_v54 = vld [vmem:[#allocation5 + $0xa28] ss:$48 sps:$4 sm:$0xff]  }
  0xe7   : > { %3135 = vmatprep.subr.bf16.mxu0 %v4343_v30  ;;  %3217 = vmatprep.subr.bf16.mxu1 %v4346_v34  ;;  %v332_v52 = vadd.f32 %v331_v9, %v330_v56  ;;  %v360_v5 = vadd.f32 %v359_v15, %v358_v38  ;;  %v526_v46 = vadd.f32 %v525_v41, %v524_v58  ;;  %v471_v61 = vrot.slane %v470_v51, 2  ;;  %v4370_v58 = vld [vmem:[#allocation5 + $0xa8c] ss:$48 sps:$4 sm:$0xff]  }
  0xe8   : > { %v388_v50 = vadd.f32 %v387_v48, %v386_v39  ;;  %v416_v59 = vadd.f32 %v415_v44, %v414_v0  ;;  %v499_v2 = vrot.slane %v498_v55, 2  ;;  %v444_v4 = vadd.f32 %v443_v45, %v442_v40  ;;  %v4365_v40 = vld [vmem:[#allocation5 + $0xa80] ss:$48 sps:$4 sm:$0xff]   ;;  %v4368_v48 = vld [vmem:[#allocation5 + $0xa88] ss:$48 sps:$4 sm:$0xff]  }
  0xe9   : > { %v333_v3 = vrot.slane %v332_v52, 1  ;;  %v361_v60 = vrot.slane %v360_v5, 1  ;;  %v527_v11 = vrot.slane %v526_v46, 2  ;;  %v472_v7 = vadd.f32 %v471_v61, %v470_v51  ;;  %v4373_v44 = vld [vmem:[#allocation5 + $0xae4] ss:$48 sps:$4 sm:$0xff]  }
  0xea   : > { %3136 = vmatpush1.bf16.msra.mxu0 %v4341_v36  ;;  %3218 = vmatpush1.bf16.msra.mxu1 %v4344_v10  ;;  %v389_v13 = vrot.slane %v388_v50, 1  ;;  %v417_v6 = vrot.slane %v416_v59, 1  ;;  %v500_v14 = vadd.f32 %v499_v2, %v498_v55  ;;  %v445_v22 = vrot.slane %v444_v4, 1  ;;  %v4367_v10 = vld [vmem:[#allocation5 + $0xa84] ss:$48 sps:$4 sm:$0xff]  }
  0xeb   : > { %3137 = vmatprep.subr.bf16.mxu0 %v4349_v43  ;;  %3219 = vmatprep.subr.bf16.mxu1 %v4352_v63  ;;  %v334_v12 = vadd.f32 %v333_v3, %v332_v52  ;;  %v362_v21 = vadd.f32 %v361_v60, %v360_v5  ;;  %v528_v20 = vadd.f32 %v527_v11, %v526_v46  ;;  %v473_v34 = vrot.slane %v472_v7, 1  ;;  %v4376_v52 = vld [vmem:[#allocation5 + $0xaec] ss:$48 sps:$4 sm:$0xff]   ;;  %v4374_v61 = vld [vmem:[#allocation5 + $0xae8] ss:$48 sps:$4 sm:$0xff]  }
  0xec   : > { %v390_v29 = vadd.f32 %v389_v13, %v388_v50  ;;  %v418_v30 = vadd.f32 %v417_v6, %v416_v59  ;;  %v501_v35 = vrot.slane %v500_v14, 1  ;;  %v446_v24 = vadd.f32 %v445_v22, %v444_v4  ;;  %v4371_v50 = vld [vmem:[#allocation5 + $0xae0] ss:$48 sps:$4 sm:$0xff]   ;;  %v4379_v2 = vld [vmem:[#allocation5 + $0xb44] ss:$48 sps:$4 sm:$0xff]  }
  0xed   : > { %v529_v25 = vrot.slane %v528_v20, 1  ;;  %v541_v27 = vmul.f32 0.0625, %v334_v12  ;;  %v545_v31 = vmul.f32 0.0625, %v362_v21  ;;  %v474_v36 = vadd.f32 %v473_v34, %v472_v7  ;;  %v4382_v60 = vld [vmem:[#allocation5 + $0xb4c] ss:$48 sps:$4 sm:$0xff]  }
  0xee   : > { %3138 = vmatpush1.bf16.msra.mxu0 %v4347_v42  ;;  %3220 = vmatpush1.bf16.msra.mxu1 %v4350_v17  ;;  %v502_v33 = vadd.f32 %v501_v35, %v500_v14  ;;  %v549_v49 = vmul.f32 0.0625, %v390_v29  ;;  %v553_v37 = vmul.f32 0.0625, %v418_v30  ;;  %v557_v56 = vmul.f32 0.0625, %v446_v24  ;;  %v4377_v13 = vld [vmem:[#allocation5 + $0xb40] ss:$48 sps:$4 sm:$0xff]  }
  0xef   : > { %3139 = vmatprep.subr.bf16.mxu0 %v4355_v62  ;;  %3221 = vmatprep.subr.bf16.mxu1 %v4358_v47  ;;  %v530_v43 = vadd.f32 %v529_v25, %v528_v20  ;;  %v573_v38 = vpack.c.bf16 %v541_v27, %v541_v27  ;;  %v577_v57 = vpack.c.bf16 %v545_v31, %v545_v31  ;;  %v561_v63 = vmul.f32 0.0625, %v474_v36  ;;  %v4380_v6 = vld [vmem:[#allocation5 + $0xb48] ss:$48 sps:$4 sm:$0xff]   ;;  %v4385_v7 = vld [vmem:[#allocation5 + $0xba4] ss:$48 sps:$4 sm:$0xff]  }
  0xf0   : > { %v565_v39 = vmul.f32 0.0625, %v502_v33  ;;  %v581_v0 = vpack.c.bf16 %v549_v49, %v549_v49  ;;  %v585_v1 = vpack.c.bf16 %v553_v37, %v553_v37  ;;  %v589_v8 = vpack.c.bf16 %v557_v56, %v557_v56  ;;  %v4383_v12 = vld [vmem:[#allocation5 + $0xba0] ss:$48 sps:$4 sm:$0xff]   ;;  %v4386_v21 = vld [vmem:[#allocation5 + $0xba8] ss:$48 sps:$4 sm:$0xff]  }
  0xf1   : > { %v1085_v9 = vunpack.c.l.b16 %v573_v38  ;;  %v1089_v15 = vunpack.c.l.b16 %v577_v57  ;;  %v593_v41 = vpack.c.bf16 %v561_v63, %v561_v63  ;;  %v569_v51 = vmul.f32 0.0625, %v530_v43  ;;  %v4391_v20 = vld [vmem:[#allocation5 + $0x14] ss:$48 sps:$4 sm:$0xff]   ;;  %v4389_v29 = vld [vmem:[#allocation5 + $0x10] ss:$48 sps:$4 sm:$0xff]  }
  0xf2   : > { %3140 = vmatpush1.bf16.msra.mxu0 %v4353_v18  ;;  %3222 = vmatpush1.bf16.msra.mxu1 %v4356_v19  ;;  %v1093_v42 = vunpack.c.l.b16 %v581_v0  ;;  %v1097_v17 = vunpack.c.l.b16 %v585_v1  ;;  %v1101_v55 = vunpack.c.l.b16 %v589_v8  ;;  %v597_v5 = vpack.c.bf16 %v565_v39, %v565_v39  ;;  %v4388_v18 = vld [vmem:[#allocation5 + $0xbac] ss:$48 sps:$4 sm:$0xff]   ;;  %v4392_v30 = vld [vmem:[#allocation5 + $0x18] ss:$48 sps:$4 sm:$0xff]   ;;  %v4397_v34 = vld [vmem:[#allocation5 + $0x74] ss:$48 sps:$4 sm:$0xff]  }
  0xf3   : > { %3141 = vmatprep.subr.bf16.mxu0 %v4361_v23  ;;  %3223 = vmatprep.subr.bf16.mxu1 %v4364_v28  ;;  %v1136_v62 = vsel %vm1115_vm0, %v1089_v15, %v1085_v9  ;;  %v1105_v46 = vunpack.c.l.b16 %v593_v41  ;;  %v601_v3 = vpack.c.bf16 %v569_v51, %v569_v51  ;;  %v4394_v23 = vld [vmem:[#allocation5 + $0x1c] ss:$48 sps:$4 sm:$0xff]   ;;  %v4395_v24 = vld [vmem:[#allocation5 + $0x70] ss:$48 sps:$4 sm:$0xff]   ;;  %v4398_v25 = vld [vmem:[#allocation5 + $0x78] ss:$48 sps:$4 sm:$0xff]  }
  0xf4   : > { %v1137_v45 = vsel %vm1117_vm1, %v1093_v42, %v1136_v62  ;;  %v1109_v4 = vunpack.c.l.b16 %v597_v5  ;;  %v4400_v35 = vld [vmem:[#allocation5 + $0x7c] ss:$48 sps:$4 sm:$0xff]   ;;  %v4403_v27 = vld [vmem:[#allocation5 + $0xd4] ss:$48 sps:$4 sm:$0xff]   ;;  %v4404_v36 = vld [vmem:[#allocation5 + $0xd8] ss:$48 sps:$4 sm:$0xff]  }
  0xf5   : > { %v1138_v47 = vsel %vm1119_vm2, %v1097_v17, %v1137_v45  ;;  %v1113_v14 = vunpack.c.l.b16 %v601_v3  ;;  %v4406_v31 = vld [vmem:[#allocation5 + $0xdc] ss:$48 sps:$4 sm:$0xff]   ;;  %v4409_v33 = vld [vmem:[#allocation5 + $0x134] ss:$48 sps:$4 sm:$0xff]   ;;  %v4407_v37 = vld [vmem:[#allocation5 + $0x130] ss:$48 sps:$4 sm:$0xff]  }
  0xf6   : > { %3142 = vmatpush1.bf16.msra.mxu0 %v4359_v32  ;;  %3224 = vmatpush1.bf16.msra.mxu1 %v4362_v54  ;;  %v1139_v59 = vsel %vm1121_vm3, %v1101_v55, %v1138_v47  ;;  %v4401_v32 = vld [vmem:[#allocation5 + $0xd0] ss:$48 sps:$4 sm:$0xff]   ;;  %v4412_v49 = vld [vmem:[#allocation5 + $0x13c] ss:$48 sps:$4 sm:$0xff]   ;;  %v4410_v54 = vld [vmem:[#allocation5 + $0x138] ss:$48 sps:$4 sm:$0xff]  }
  0xf7   : > { %3143 = vmatprep.subr.bf16.mxu0 %v4367_v10  ;;  %3225 = vmatprep.subr.bf16.mxu1 %v4370_v58  ;;  %v1140_v11 = vsel %vm1123_vm4, %v1105_v46, %v1139_v59  ;;  %v4415_v10 = vld [vmem:[#allocation5 + $0x194] ss:$48 sps:$4 sm:$0xff]   ;;  %v4418_v43 = vld [vmem:[#allocation5 + $0x19c] ss:$48 sps:$4 sm:$0xff]   ;;  %v4413_v56 = vld [vmem:[#allocation5 + $0x190] ss:$48 sps:$4 sm:$0xff]  }
  0xf8   : > { %v1141_v19 = vsel %vm1125_vm5, %v1109_v4, %v1140_v11  ;;  %v4416_v38 = vld [vmem:[#allocation5 + $0x198] ss:$48 sps:$4 sm:$0xff]   ;;  %v4421_v57 = vld [vmem:[#allocation5 + $0x1f4] ss:$48 sps:$4 sm:$0xff]   ;;  %v4424_v58 = vld [vmem:[#allocation5 + $0x1fc] ss:$48 sps:$4 sm:$0xff]  }
  0xf9   : > { %v1142_v22 = vsel %vm1127_vm6, %v1113_v14, %v1141_v19  ;;  %v4419_v63 = vld [vmem:[#allocation5 + $0x1f0] ss:$48 sps:$4 sm:$0xff]   ;;  %v4422_v39 = vld [vmem:[#allocation5 + $0x1f8] ss:$48 sps:$4 sm:$0xff]   ;;  %v4427_v0 = vld [vmem:[#allocation5 + $0x254] ss:$48 sps:$4 sm:$0xff]  }
  0xfa   : > { %3144 = vmatpush1.bf16.msra.mxu0 %v4365_v40  ;;  %3226 = vmatpush1.bf16.msra.mxu1 %v4368_v48  ;;  %v5355_v28 = vpack.c.b16 %v1142_v22, %v1142_v22  ;;  %v4430_v1 = vld [vmem:[#allocation5 + $0x25c] ss:$48 sps:$4 sm:$0xff]   ;;  %v4425_v8 = vld [vmem:[#allocation5 + $0x250] ss:$48 sps:$4 sm:$0xff]   ;;  %v4428_v9 = vld [vmem:[#allocation5 + $0x258] ss:$48 sps:$4 sm:$0xff]  }
  0xfb   : > { %3145 = vmatprep.subr.bf16.mxu0 %v4373_v44  ;;  %3227 = vmatprep.subr.bf16.mxu1 %v4376_v52  ;;  %v4433_v15 = vld [vmem:[#allocation5 + $0x2b4] ss:$48 sps:$4 sm:$0xff]   ;;  %v4436_v40 = vld [vmem:[#allocation5 + $0x2bc] ss:$48 sps:$4 sm:$0xff]   ;;  %v4431_v41 = vld [vmem:[#allocation5 + $0x2b0] ss:$48 sps:$4 sm:$0xff]  }
  0xfc   : > { %v4434_v42 = vld [vmem:[#allocation5 + $0x2b8] ss:$48 sps:$4 sm:$0xff]   ;;  %v4439_v17 = vld [vmem:[#allocation5 + $0x314] ss:$48 sps:$4 sm:$0xff]   ;;  %v4442_v48 = vld [vmem:[#allocation5 + $0x31c] ss:$48 sps:$4 sm:$0xff]  }
  0xfd   : > { %v4437_v44 = vld [vmem:[#allocation5 + $0x310] ss:$48 sps:$4 sm:$0xff]   ;;  %v4440_v51 = vld [vmem:[#allocation5 + $0x318] ss:$48 sps:$4 sm:$0xff]   ;;  %v4445_v55 = vld [vmem:[#allocation5 + $0x374] ss:$48 sps:$4 sm:$0xff]  }
  0xfe   : > { %3146 = vmatpush1.bf16.msra.mxu0 %v4371_v50  ;;  %3228 = vmatpush1.bf16.msra.mxu1 %v4374_v61  ;;  %v4448_v62 = vld [vmem:[#allocation5 + $0x37c] ss:$48 sps:$4 sm:$0xff]   ;;  %v4443_v52 = vld [vmem:[#allocation5 + $0x370] ss:$48 sps:$4 sm:$0xff]   ;;  %v4446_v5 = vld [vmem:[#allocation5 + $0x378] ss:$48 sps:$4 sm:$0xff]  }
  0xff   : > { %3147 = vmatprep.subr.bf16.mxu0 %v4379_v2  ;;  %3229 = vmatprep.subr.bf16.mxu1 %v4382_v60  ;;  %v4451_v45 = vld [vmem:[#allocation5 + $0x3d4] ss:$48 sps:$4 sm:$0xff]   ;;  %v4454_v46 = vld [vmem:[#allocation5 + $0x3dc] ss:$48 sps:$4 sm:$0xff]   ;;  %v4449_v47 = vld [vmem:[#allocation5 + $0x3d0] ss:$48 sps:$4 sm:$0xff]  }
 0x100   : > { %v4452_v50 = vld [vmem:[#allocation5 + $0x3d8] ss:$48 sps:$4 sm:$0xff]   ;;  %v4457_v59 = vld [vmem:[#allocation5 + $0x434] ss:$48 sps:$4 sm:$0xff]   ;;  %v4460_v61 = vld [vmem:[#allocation5 + $0x43c] ss:$48 sps:$4 sm:$0xff]  }
 0x101   : > { %v4455_v2 = vld [vmem:[#allocation5 + $0x430] ss:$48 sps:$4 sm:$0xff]   ;;  %v4458_v3 = vld [vmem:[#allocation5 + $0x438] ss:$48 sps:$4 sm:$0xff]   ;;  %v4463_v60 = vld [vmem:[#allocation5 + $0x494] ss:$48 sps:$4 sm:$0xff]  }
 0x102   : > { %3148 = vmatpush1.bf16.msra.mxu0 %v4377_v13  ;;  %3230 = vmatpush1.bf16.msra.mxu1 %v4380_v6  ;;  %v4466_v4 = vld [vmem:[#allocation5 + $0x49c] ss:$48 sps:$4 sm:$0xff]   ;;  %v4461_v11 = vld [vmem:[#allocation5 + $0x490] ss:$48 sps:$4 sm:$0xff]   ;;  %v4464_v13 = vld [vmem:[#allocation5 + $0x498] ss:$48 sps:$4 sm:$0xff]  }
 0x103   : > { %3149 = vmatprep.subr.bf16.mxu0 %v4385_v7  ;;  %3231 = vmatprep.subr.bf16.mxu1 %v4388_v18  ;;  %v4469_v6 = vld [vmem:[#allocation5 + $0x4f4] ss:$48 sps:$4 sm:$0xff]   ;;  %v4472_v7 = vld [vmem:[#allocation5 + $0x4fc] ss:$48 sps:$4 sm:$0xff]   ;;  %v4467_v14 = vld [vmem:[#allocation5 + $0x4f0] ss:$48 sps:$4 sm:$0xff]  }
 0x104   : > { %v4470_v18 = vld [vmem:[#allocation5 + $0x4f8] ss:$48 sps:$4 sm:$0xff]   ;;  %v4475_v19 = vld [vmem:[#allocation5 + $0x554] ss:$48 sps:$4 sm:$0xff]  }
 0x105   : > { %v4476_v22 = vld [vmem:[#allocation5 + $0x558] ss:$48 sps:$4 sm:$0xff]  }
 0x106   : > { %3150 = vmatpush1.bf16.msra.mxu0 %v4383_v12  ;;  %3232 = vmatpush1.bf16.msra.mxu1 %v4386_v21  ;;  %v4478_v12 = vld [vmem:[#allocation5 + $0x55c] ss:$48 sps:$4 sm:$0xff]   ;;  %v4473_v21 = vld [vmem:[#allocation5 + $0x550] ss:$48 sps:$4 sm:$0xff]  }
 0x107   : > { %3242 = vmatprep.subr.bf16.mxu0 %v4391_v20  ;;  %3324 = vmatprep.subr.bf16.mxu1 %v4394_v23  ;;  %v4481_v20 = vld [vmem:[#allocation5 + $0x5b4] ss:$48 sps:$4 sm:$0xff]   ;;  %v4484_v23 = vld [vmem:[#allocation5 + $0x5bc] ss:$48 sps:$4 sm:$0xff]  }
 0x109   : > { %3152 = vmatmul.mubr.bf16.vlgmr.msra.gmra.mrb[0].mxu0 %v5355_v28  ;;  %3234 = vmatmul.mubr.bf16.vlgmr.msra.gmra.mrb[0].mxu1 %v5355_v28 }
 0x10a   : > { %3243 = vmatpush1.bf16.msra.mxu0 %v4389_v29  ;;  %3325 = vmatpush1.bf16.msra.mxu1 %v4392_v30  ;;  %v4479_v29 = vld [vmem:[#allocation5 + $0x5b0] ss:$48 sps:$4 sm:$0xff]   ;;  %v4482_v30 = vld [vmem:[#allocation5 + $0x5b8] ss:$48 sps:$4 sm:$0xff]  }
 0x10b   : > { %3244 = vmatprep.subr.bf16.mxu0 %v4397_v34  ;;  %3326 = vmatprep.subr.bf16.mxu1 %v4400_v35  ;;  %v4487_v34 = vld [vmem:[#allocation5 + $0x614] ss:$48 sps:$4 sm:$0xff]   ;;  %v4490_v35 = vld [vmem:[#allocation5 + $0x61c] ss:$48 sps:$4 sm:$0xff]  }
 0x10c   : > { %3274 = vmatprep.mubr.bf16.mxu0 %v5238_v16  ;;  %3356 = vmatprep.mubr.bf16.mxu1 %v5238_v16 }
 0x10e   : > { %3245 = vmatpush1.bf16.msra.mxu0 %v4395_v24  ;;  %3327 = vmatpush1.bf16.msra.mxu1 %v4398_v25  ;;  %v4485_v24 = vld [vmem:[#allocation5 + $0x610] ss:$48 sps:$4 sm:$0xff]   ;;  %v4488_v25 = vld [vmem:[#allocation5 + $0x618] ss:$48 sps:$4 sm:$0xff]  }
 0x10f   : > { %3246 = vmatprep.subr.bf16.mxu0 %v4403_v27  ;;  %3328 = vmatprep.subr.bf16.mxu1 %v4406_v31  ;;  %v4493_v27 = vld [vmem:[#allocation5 + $0x674] ss:$48 sps:$4 sm:$0xff]   ;;  %v4496_v31 = vld [vmem:[#allocation5 + $0x67c] ss:$48 sps:$4 sm:$0xff]  }
 0x112   : > { %3247 = vmatpush1.bf16.msra.mxu0 %v4401_v32  ;;  %3329 = vmatpush1.bf16.msra.mxu1 %v4404_v36  ;;  %v4491_v32 = vld [vmem:[#allocation5 + $0x670] ss:$48 sps:$4 sm:$0xff]   ;;  %v4494_v36 = vld [vmem:[#allocation5 + $0x678] ss:$48 sps:$4 sm:$0xff]  }
 0x113   : > { %3248 = vmatprep.subr.bf16.mxu0 %v4409_v33  ;;  %3330 = vmatprep.subr.bf16.mxu1 %v4412_v49  ;;  %v4499_v33 = vld [vmem:[#allocation5 + $0x6d4] ss:$48 sps:$4 sm:$0xff]   ;;  %v4502_v49 = vld [vmem:[#allocation5 + $0x6dc] ss:$48 sps:$4 sm:$0xff]  }
 0x116   : > { %3249 = vmatpush1.bf16.msra.mxu0 %v4407_v37  ;;  %3331 = vmatpush1.bf16.msra.mxu1 %v4410_v54  ;;  %v4497_v37 = vld [vmem:[#allocation5 + $0x6d0] ss:$48 sps:$4 sm:$0xff]   ;;  %v4500_v54 = vld [vmem:[#allocation5 + $0x6d8] ss:$48 sps:$4 sm:$0xff]  }
 0x117   : > { %3250 = vmatprep.subr.bf16.mxu0 %v4415_v10  ;;  %3332 = vmatprep.subr.bf16.mxu1 %v4418_v43  ;;  %v4505_v10 = vld [vmem:[#allocation5 + $0x734] ss:$48 sps:$4 sm:$0xff]   ;;  %v4508_v43 = vld [vmem:[#allocation5 + $0x73c] ss:$48 sps:$4 sm:$0xff]  }
 0x11a   : > { %3251 = vmatpush1.bf16.msra.mxu0 %v4413_v56  ;;  %3333 = vmatpush1.bf16.msra.mxu1 %v4416_v38  ;;  %v4503_v56 = vld [vmem:[#allocation5 + $0x730] ss:$48 sps:$4 sm:$0xff]   ;;  %v4506_v38 = vld [vmem:[#allocation5 + $0x738] ss:$48 sps:$4 sm:$0xff]  }
 0x11b   : > { %3252 = vmatprep.subr.bf16.mxu0 %v4421_v57  ;;  %3334 = vmatprep.subr.bf16.mxu1 %v4424_v58  ;;  %v4511_v57 = vld [vmem:[#allocation5 + $0x794] ss:$48 sps:$4 sm:$0xff]   ;;  %v4514_v58 = vld [vmem:[#allocation5 + $0x79c] ss:$48 sps:$4 sm:$0xff]  }
 0x11e   : > { %3253 = vmatpush1.bf16.msra.mxu0 %v4419_v63  ;;  %3335 = vmatpush1.bf16.msra.mxu1 %v4422_v39  ;;  %v4509_v63 = vld [vmem:[#allocation5 + $0x790] ss:$48 sps:$4 sm:$0xff]   ;;  %v4512_v39 = vld [vmem:[#allocation5 + $0x798] ss:$48 sps:$4 sm:$0xff]  }
 0x11f   : > { %3254 = vmatprep.subr.bf16.mxu0 %v4427_v0  ;;  %3336 = vmatprep.subr.bf16.mxu1 %v4430_v1  ;;  %v4517_v0 = vld [vmem:[#allocation5 + $0x7f4] ss:$48 sps:$4 sm:$0xff]   ;;  %v4520_v1 = vld [vmem:[#allocation5 + $0x7fc] ss:$48 sps:$4 sm:$0xff]  }
 0x122   : > { %3255 = vmatpush1.bf16.msra.mxu0 %v4425_v8  ;;  %3337 = vmatpush1.bf16.msra.mxu1 %v4428_v9  ;;  %v4515_v8 = vld [vmem:[#allocation5 + $0x7f0] ss:$48 sps:$4 sm:$0xff]   ;;  %v4518_v9 = vld [vmem:[#allocation5 + $0x7f8] ss:$48 sps:$4 sm:$0xff]  }
 0x123   : > { %3256 = vmatprep.subr.bf16.mxu0 %v4433_v15  ;;  %3338 = vmatprep.subr.bf16.mxu1 %v4436_v40  ;;  %v4523_v15 = vld [vmem:[#allocation5 + $0x854] ss:$48 sps:$4 sm:$0xff]   ;;  %v4526_v40 = vld [vmem:[#allocation5 + $0x85c] ss:$48 sps:$4 sm:$0xff]  }
 0x126   : > { %3257 = vmatpush1.bf16.msra.mxu0 %v4431_v41  ;;  %3339 = vmatpush1.bf16.msra.mxu1 %v4434_v42  ;;  %v4521_v41 = vld [vmem:[#allocation5 + $0x850] ss:$48 sps:$4 sm:$0xff]   ;;  %v4524_v42 = vld [vmem:[#allocation5 + $0x858] ss:$48 sps:$4 sm:$0xff]  }
 0x127   : > { %3258 = vmatprep.subr.bf16.mxu0 %v4439_v17  ;;  %3340 = vmatprep.subr.bf16.mxu1 %v4442_v48  ;;  %v4529_v17 = vld [vmem:[#allocation5 + $0x8b4] ss:$48 sps:$4 sm:$0xff]   ;;  %v4532_v48 = vld [vmem:[#allocation5 + $0x8bc] ss:$48 sps:$4 sm:$0xff]  }
 0x12a   : > { %3259 = vmatpush1.bf16.msra.mxu0 %v4437_v44  ;;  %3341 = vmatpush1.bf16.msra.mxu1 %v4440_v51  ;;  %v4527_v44 = vld [vmem:[#allocation5 + $0x8b0] ss:$48 sps:$4 sm:$0xff]   ;;  %v4530_v51 = vld [vmem:[#allocation5 + $0x8b8] ss:$48 sps:$4 sm:$0xff]  }
 0x12b   : > { %3260 = vmatprep.subr.bf16.mxu0 %v4445_v55  ;;  %3342 = vmatprep.subr.bf16.mxu1 %v4448_v62  ;;  %v4535_v55 = vld [vmem:[#allocation5 + $0x914] ss:$48 sps:$4 sm:$0xff]   ;;  %v4538_v62 = vld [vmem:[#allocation5 + $0x91c] ss:$48 sps:$4 sm:$0xff]  }
 0x12e   : > { %3261 = vmatpush1.bf16.msra.mxu0 %v4443_v52  ;;  %3343 = vmatpush1.bf16.msra.mxu1 %v4446_v5  ;;  %v4533_v52 = vld [vmem:[#allocation5 + $0x910] ss:$48 sps:$4 sm:$0xff]   ;;  %v4536_v5 = vld [vmem:[#allocation5 + $0x918] ss:$48 sps:$4 sm:$0xff]  }
 0x12f   : > { %3262 = vmatprep.subr.bf16.mxu0 %v4451_v45  ;;  %3344 = vmatprep.subr.bf16.mxu1 %v4454_v46  ;;  %v4541_v45 = vld [vmem:[#allocation5 + $0x974] ss:$48 sps:$4 sm:$0xff]   ;;  %v4544_v46 = vld [vmem:[#allocation5 + $0x97c] ss:$48 sps:$4 sm:$0xff]  }
 0x132   : > { %3263 = vmatpush1.bf16.msra.mxu0 %v4449_v47  ;;  %3345 = vmatpush1.bf16.msra.mxu1 %v4452_v50  ;;  %v4539_v47 = vld [vmem:[#allocation5 + $0x970] ss:$48 sps:$4 sm:$0xff]   ;;  %v4542_v50 = vld [vmem:[#allocation5 + $0x978] ss:$48 sps:$4 sm:$0xff]  }
 0x133   : > { %3264 = vmatprep.subr.bf16.mxu0 %v4457_v59  ;;  %3346 = vmatprep.subr.bf16.mxu1 %v4460_v61  ;;  %v4547_v59 = vld [vmem:[#allocation5 + $0x9d4] ss:$48 sps:$4 sm:$0xff]   ;;  %v4550_v61 = vld [vmem:[#allocation5 + $0x9dc] ss:$48 sps:$4 sm:$0xff]  }
 0x136   : > { %3265 = vmatpush1.bf16.msra.mxu0 %v4455_v2  ;;  %3347 = vmatpush1.bf16.msra.mxu1 %v4458_v3  ;;  %v4545_v2 = vld [vmem:[#allocation5 + $0x9d0] ss:$48 sps:$4 sm:$0xff]   ;;  %v4548_v3 = vld [vmem:[#allocation5 + $0x9d8] ss:$48 sps:$4 sm:$0xff]  }
 0x137   : > { %3266 = vmatprep.subr.bf16.mxu0 %v4463_v60  ;;  %3348 = vmatprep.subr.bf16.mxu1 %v4466_v4  ;;  %v4553_v60 = vld [vmem:[#allocation5 + $0xa34] ss:$48 sps:$4 sm:$0xff]   ;;  %v4556_v4 = vld [vmem:[#allocation5 + $0xa3c] ss:$48 sps:$4 sm:$0xff]  }
 0x13a   : > { %3267 = vmatpush1.bf16.msra.mxu0 %v4461_v11  ;;  %3349 = vmatpush1.bf16.msra.mxu1 %v4464_v13  ;;  %v4551_v11 = vld [vmem:[#allocation5 + $0xa30] ss:$48 sps:$4 sm:$0xff]   ;;  %v4554_v13 = vld [vmem:[#allocation5 + $0xa38] ss:$48 sps:$4 sm:$0xff]  }
 0x13b   : > { %3268 = vmatprep.subr.bf16.mxu0 %v4469_v6  ;;  %3350 = vmatprep.subr.bf16.mxu1 %v4472_v7  ;;  %v4559_v6 = vld [vmem:[#allocation5 + $0xa94] ss:$48 sps:$4 sm:$0xff]   ;;  %v4562_v7 = vld [vmem:[#allocation5 + $0xa9c] ss:$48 sps:$4 sm:$0xff]  }
 0x13e   : > { %3269 = vmatpush1.bf16.msra.mxu0 %v4467_v14  ;;  %3351 = vmatpush1.bf16.msra.mxu1 %v4470_v18  ;;  %v4557_v14 = vld [vmem:[#allocation5 + $0xa90] ss:$48 sps:$4 sm:$0xff]   ;;  %v4560_v18 = vld [vmem:[#allocation5 + $0xa98] ss:$48 sps:$4 sm:$0xff]  }
 0x13f   : > { %3270 = vmatprep.subr.bf16.mxu0 %v4475_v19  ;;  %3352 = vmatprep.subr.bf16.mxu1 %v4478_v12  ;;  %v4565_v19 = vld [vmem:[#allocation5 + $0xaf4] ss:$48 sps:$4 sm:$0xff]   ;;  %v4568_v12 = vld [vmem:[#allocation5 + $0xafc] ss:$48 sps:$4 sm:$0xff]  }
 0x142   : > { %3271 = vmatpush1.bf16.msra.mxu0 %v4473_v21  ;;  %3353 = vmatpush1.bf16.msra.mxu1 %v4476_v22  ;;  %v4563_v21 = vld [vmem:[#allocation5 + $0xaf0] ss:$48 sps:$4 sm:$0xff]   ;;  %v4566_v22 = vld [vmem:[#allocation5 + $0xaf8] ss:$48 sps:$4 sm:$0xff]  }
 0x143   : > { %3272 = vmatprep.subr.bf16.mxu0 %v4481_v20  ;;  %3354 = vmatprep.subr.bf16.mxu1 %v4484_v23  ;;  %v4571_v20 = vld [vmem:[#allocation5 + $0xb54] ss:$48 sps:$4 sm:$0xff]   ;;  %v4574_v23 = vld [vmem:[#allocation5 + $0xb5c] ss:$48 sps:$4 sm:$0xff]  }
 0x146   : > { %3273 = vmatpush1.bf16.msra.mxu0 %v4479_v29  ;;  %3355 = vmatpush1.bf16.msra.mxu1 %v4482_v30  ;;  %v4569_v29 = vld [vmem:[#allocation5 + $0xb50] ss:$48 sps:$4 sm:$0xff]   ;;  %v4572_v30 = vld [vmem:[#allocation5 + $0xb58] ss:$48 sps:$4 sm:$0xff]  }
 0x147   : > { %3283 = vmatprep.subr.bf16.mxu0 %v4487_v34  ;;  %3365 = vmatprep.subr.bf16.mxu1 %v4490_v35  ;;  %v4577_v34 = vld [vmem:[#allocation5 + $0xbb4] ss:$48 sps:$4 sm:$0xff]   ;;  %v4580_v35 = vld [vmem:[#allocation5 + $0xbbc] ss:$48 sps:$4 sm:$0xff]  }
 0x149   : > { %3275 = vmatmul.mubr.bf16.vlgmr.msra.gmra.mrb[4].mxu0 %v5297_v53  ;;  %3357 = vmatmul.mubr.bf16.vlgmr.msra.gmra.mrb[4].mxu1 %v5297_v53 }
 0x14a   : > { %3284 = vmatpush1.bf16.msra.mxu0 %v4485_v24  ;;  %3366 = vmatpush1.bf16.msra.mxu1 %v4488_v25  ;;  %v4575_v24 = vld [vmem:[#allocation5 + $0xbb0] ss:$48 sps:$4 sm:$0xff]   ;;  %v4578_v25 = vld [vmem:[#allocation5 + $0xbb8] ss:$48 sps:$4 sm:$0xff]  }
 0x14b   : > { %3285 = vmatprep.subr.bf16.mxu0 %v4493_v27  ;;  %3367 = vmatprep.subr.bf16.mxu1 %v4496_v31  ;;  %v4583_v27 = vld [vmem:[#allocation5 + $0x24] ss:$48 sps:$4 sm:$0xff]   ;;  %v4586_v31 = vld [vmem:[#allocation5 + $0x2c] ss:$48 sps:$4 sm:$0xff]  }
 0x14c   : > { %3315 = vmatprep.mubr.bf16.mxu0 %v5344_v26  ;;  %3397 = vmatprep.mubr.bf16.mxu1 %v5344_v26 }
 0x14e   : > { %3286 = vmatpush1.bf16.msra.mxu0 %v4491_v32  ;;  %3368 = vmatpush1.bf16.msra.mxu1 %v4494_v36  ;;  %v4581_v32 = vld [vmem:[#allocation5 + $0x20] ss:$48 sps:$4 sm:$0xff]   ;;  %v4584_v36 = vld [vmem:[#allocation5 + $0x28] ss:$48 sps:$4 sm:$0xff]  }
 0x14f   : > { %3287 = vmatprep.subr.bf16.mxu0 %v4499_v33  ;;  %3369 = vmatprep.subr.bf16.mxu1 %v4502_v49  ;;  %v4589_v33 = vld [vmem:[#allocation5 + $0x84] ss:$48 sps:$4 sm:$0xff]   ;;  %v4592_v49 = vld [vmem:[#allocation5 + $0x8c] ss:$48 sps:$4 sm:$0xff]  }
 0x152   : > { %3288 = vmatpush1.bf16.msra.mxu0 %v4497_v37  ;;  %3370 = vmatpush1.bf16.msra.mxu1 %v4500_v54  ;;  %v4587_v37 = vld [vmem:[#allocation5 + $0x80] ss:$48 sps:$4 sm:$0xff]   ;;  %v4590_v54 = vld [vmem:[#allocation5 + $0x88] ss:$48 sps:$4 sm:$0xff]  }
 0x153   : > { %3289 = vmatprep.subr.bf16.mxu0 %v4505_v10  ;;  %3371 = vmatprep.subr.bf16.mxu1 %v4508_v43  ;;  %v4595_v10 = vld [vmem:[#allocation5 + $0xe4] ss:$48 sps:$4 sm:$0xff]   ;;  %v4598_v43 = vld [vmem:[#allocation5 + $0xec] ss:$48 sps:$4 sm:$0xff]  }
 0x156   : > { %3290 = vmatpush1.bf16.msra.mxu0 %v4503_v56  ;;  %3372 = vmatpush1.bf16.msra.mxu1 %v4506_v38  ;;  %v4593_v56 = vld [vmem:[#allocation5 + $0xe0] ss:$48 sps:$4 sm:$0xff]   ;;  %v4596_v38 = vld [vmem:[#allocation5 + $0xe8] ss:$48 sps:$4 sm:$0xff]  }
 0x157   : > { %3291 = vmatprep.subr.bf16.mxu0 %v4511_v57  ;;  %3373 = vmatprep.subr.bf16.mxu1 %v4514_v58  ;;  %v4601_v57 = vld [vmem:[#allocation5 + $0x144] ss:$48 sps:$4 sm:$0xff]   ;;  %v4604_v58 = vld [vmem:[#allocation5 + $0x14c] ss:$48 sps:$4 sm:$0xff]  }
 0x15a   : > { %3292 = vmatpush1.bf16.msra.mxu0 %v4509_v63  ;;  %3374 = vmatpush1.bf16.msra.mxu1 %v4512_v39  ;;  %v4599_v63 = vld [vmem:[#allocation5 + $0x140] ss:$48 sps:$4 sm:$0xff]   ;;  %v4602_v39 = vld [vmem:[#allocation5 + $0x148] ss:$48 sps:$4 sm:$0xff]  }
 0x15b   : > { %3293 = vmatprep.subr.bf16.mxu0 %v4517_v0  ;;  %3375 = vmatprep.subr.bf16.mxu1 %v4520_v1  ;;  %v4607_v0 = vld [vmem:[#allocation5 + $0x1a4] ss:$48 sps:$4 sm:$0xff]   ;;  %v4610_v1 = vld [vmem:[#allocation5 + $0x1ac] ss:$48 sps:$4 sm:$0xff]  }
 0x15e   : > { %3294 = vmatpush1.bf16.msra.mxu0 %v4515_v8  ;;  %3376 = vmatpush1.bf16.msra.mxu1 %v4518_v9  ;;  %v4605_v8 = vld [vmem:[#allocation5 + $0x1a0] ss:$48 sps:$4 sm:$0xff]   ;;  %v4613_v9 = vld [vmem:[#allocation5 + $0x204] ss:$48 sps:$4 sm:$0xff]  }
 0x15f   : > { %3295 = vmatprep.subr.bf16.mxu0 %v4523_v15  ;;  %3377 = vmatprep.subr.bf16.mxu1 %v4526_v40  ;;  %v4616_v15 = vld [vmem:[#allocation5 + $0x20c] ss:$48 sps:$4 sm:$0xff]   ;;  %v4611_v40 = vld [vmem:[#allocation5 + $0x200] ss:$48 sps:$4 sm:$0xff]  }
 0x162   : > { %3296 = vmatpush1.bf16.msra.mxu0 %v4521_v41  ;;  %3378 = vmatpush1.bf16.msra.mxu1 %v4524_v42  ;;  %v4614_v41 = vld [vmem:[#allocation5 + $0x208] ss:$48 sps:$4 sm:$0xff]   ;;  %v4619_v42 = vld [vmem:[#allocation5 + $0x264] ss:$48 sps:$4 sm:$0xff]  }
 0x163   : > { %3297 = vmatprep.subr.bf16.mxu0 %v4529_v17  ;;  %3379 = vmatprep.subr.bf16.mxu1 %v4532_v48  ;;  %v4622_v17 = vld [vmem:[#allocation5 + $0x26c] ss:$48 sps:$4 sm:$0xff]   ;;  %v4617_v48 = vld [vmem:[#allocation5 + $0x260] ss:$48 sps:$4 sm:$0xff]  }
 0x166   : > { %3298 = vmatpush1.bf16.msra.mxu0 %v4527_v44  ;;  %3380 = vmatpush1.bf16.msra.mxu1 %v4530_v51  ;;  %v4620_v44 = vld [vmem:[#allocation5 + $0x268] ss:$48 sps:$4 sm:$0xff]   ;;  %v4625_v51 = vld [vmem:[#allocation5 + $0x2c4] ss:$48 sps:$4 sm:$0xff]  }
 0x167   : > { %3299 = vmatprep.subr.bf16.mxu0 %v4535_v55  ;;  %3381 = vmatprep.subr.bf16.mxu1 %v4538_v62  ;;  %v4628_v55 = vld [vmem:[#allocation5 + $0x2cc] ss:$48 sps:$4 sm:$0xff]   ;;  %v4623_v62 = vld [vmem:[#allocation5 + $0x2c0] ss:$48 sps:$4 sm:$0xff]  }
 0x16a   : > { %3300 = vmatpush1.bf16.msra.mxu0 %v4533_v52  ;;  %3382 = vmatpush1.bf16.msra.mxu1 %v4536_v5  ;;  %v4626_v52 = vld [vmem:[#allocation5 + $0x2c8] ss:$48 sps:$4 sm:$0xff]   ;;  %v4631_v5 = vld [vmem:[#allocation5 + $0x324] ss:$48 sps:$4 sm:$0xff]  }
 0x16b   : > { %3301 = vmatprep.subr.bf16.mxu0 %v4541_v45  ;;  %3383 = vmatprep.subr.bf16.mxu1 %v4544_v46  ;;  %v4634_v45 = vld [vmem:[#allocation5 + $0x32c] ss:$48 sps:$4 sm:$0xff]   ;;  %v4629_v46 = vld [vmem:[#allocation5 + $0x320] ss:$48 sps:$4 sm:$0xff]  }
 0x16e   : > { %3302 = vmatpush1.bf16.msra.mxu0 %v4539_v47  ;;  %3384 = vmatpush1.bf16.msra.mxu1 %v4542_v50  ;;  %v4632_v47 = vld [vmem:[#allocation5 + $0x328] ss:$48 sps:$4 sm:$0xff]   ;;  %v4637_v50 = vld [vmem:[#allocation5 + $0x384] ss:$48 sps:$4 sm:$0xff]  }
 0x16f   : > { %3303 = vmatprep.subr.bf16.mxu0 %v4547_v59  ;;  %3385 = vmatprep.subr.bf16.mxu1 %v4550_v61  ;;  %v4640_v59 = vld [vmem:[#allocation5 + $0x38c] ss:$48 sps:$4 sm:$0xff]   ;;  %v4635_v61 = vld [vmem:[#allocation5 + $0x380] ss:$48 sps:$4 sm:$0xff]  }
 0x172   : > { %3304 = vmatpush1.bf16.msra.mxu0 %v4545_v2  ;;  %3386 = vmatpush1.bf16.msra.mxu1 %v4548_v3  ;;  %v4638_v2 = vld [vmem:[#allocation5 + $0x388] ss:$48 sps:$4 sm:$0xff]   ;;  %v4643_v3 = vld [vmem:[#allocation5 + $0x3e4] ss:$48 sps:$4 sm:$0xff]  }
 0x173   : > { %3305 = vmatprep.subr.bf16.mxu0 %v4553_v60  ;;  %3387 = vmatprep.subr.bf16.mxu1 %v4556_v4  ;;  %v4646_v60 = vld [vmem:[#allocation5 + $0x3ec] ss:$48 sps:$4 sm:$0xff]   ;;  %v4641_v4 = vld [vmem:[#allocation5 + $0x3e0] ss:$48 sps:$4 sm:$0xff]  }
 0x176   : > { %3306 = vmatpush1.bf16.msra.mxu0 %v4551_v11  ;;  %3388 = vmatpush1.bf16.msra.mxu1 %v4554_v13  ;;  %v4644_v11 = vld [vmem:[#allocation5 + $0x3e8] ss:$48 sps:$4 sm:$0xff]   ;;  %v4649_v13 = vld [vmem:[#allocation5 + $0x444] ss:$48 sps:$4 sm:$0xff]  }
 0x177   : > { %3307 = vmatprep.subr.bf16.mxu0 %v4559_v6  ;;  %3389 = vmatprep.subr.bf16.mxu1 %v4562_v7  ;;  %v4652_v6 = vld [vmem:[#allocation5 + $0x44c] ss:$48 sps:$4 sm:$0xff]   ;;  %v4647_v7 = vld [vmem:[#allocation5 + $0x440] ss:$48 sps:$4 sm:$0xff]  }
 0x17a   : > { %3308 = vmatpush1.bf16.msra.mxu0 %v4557_v14  ;;  %3390 = vmatpush1.bf16.msra.mxu1 %v4560_v18  ;;  %v4650_v14 = vld [vmem:[#allocation5 + $0x448] ss:$48 sps:$4 sm:$0xff]   ;;  %v4655_v18 = vld [vmem:[#allocation5 + $0x4a4] ss:$48 sps:$4 sm:$0xff]  }
 0x17b   : > { %3309 = vmatprep.subr.bf16.mxu0 %v4565_v19  ;;  %3391 = vmatprep.subr.bf16.mxu1 %v4568_v12  ;;  %v4658_v19 = vld [vmem:[#allocation5 + $0x4ac] ss:$48 sps:$4 sm:$0xff]   ;;  %v4653_v12 = vld [vmem:[#allocation5 + $0x4a0] ss:$48 sps:$4 sm:$0xff]  }
 0x17e   : > { %3310 = vmatpush1.bf16.msra.mxu0 %v4563_v21  ;;  %3392 = vmatpush1.bf16.msra.mxu1 %v4566_v22  ;;  %v4656_v21 = vld [vmem:[#allocation5 + $0x4a8] ss:$48 sps:$4 sm:$0xff]   ;;  %v4661_v22 = vld [vmem:[#allocation5 + $0x504] ss:$48 sps:$4 sm:$0xff]  }
 0x17f   : > { %3311 = vmatprep.subr.bf16.mxu0 %v4571_v20  ;;  %3393 = vmatprep.subr.bf16.mxu1 %v4574_v23  ;;  %v4664_v20 = vld [vmem:[#allocation5 + $0x50c] ss:$48 sps:$4 sm:$0xff]   ;;  %v4659_v23 = vld [vmem:[#allocation5 + $0x500] ss:$48 sps:$4 sm:$0xff]  }
 0x182   : > { %3312 = vmatpush1.bf16.msra.mxu0 %v4569_v29  ;;  %3394 = vmatpush1.bf16.msra.mxu1 %v4572_v30  ;;  %v4662_v29 = vld [vmem:[#allocation5 + $0x508] ss:$48 sps:$4 sm:$0xff]   ;;  %v4667_v30 = vld [vmem:[#allocation5 + $0x564] ss:$48 sps:$4 sm:$0xff]  }
 0x183   : > { %3313 = vmatprep.subr.bf16.mxu0 %v4577_v34  ;;  %3395 = vmatprep.subr.bf16.mxu1 %v4580_v35  ;;  %v4670_v34 = vld [vmem:[#allocation5 + $0x56c] ss:$48 sps:$4 sm:$0xff]   ;;  %v4665_v35 = vld [vmem:[#allocation5 + $0x560] ss:$48 sps:$4 sm:$0xff]  }
 0x186   : > { %3314 = vmatpush1.bf16.msra.mxu0 %v4575_v24  ;;  %3396 = vmatpush1.bf16.msra.mxu1 %v4578_v25  ;;  %v4668_v24 = vld [vmem:[#allocation5 + $0x568] ss:$48 sps:$4 sm:$0xff]   ;;  %v4673_v25 = vld [vmem:[#allocation5 + $0x5c4] ss:$48 sps:$4 sm:$0xff]  }
 0x187   : > { %3406 = vmatprep.subr.bf16.mxu0 %v4583_v27  ;;  %3488 = vmatprep.subr.bf16.mxu1 %v4586_v31  ;;  %v4676_v27 = vld [vmem:[#allocation5 + $0x5cc] ss:$48 sps:$4 sm:$0xff]   ;;  %v4671_v31 = vld [vmem:[#allocation5 + $0x5c0] ss:$48 sps:$4 sm:$0xff]  }
 0x189   : > { %3316 = vmatmul.mubr.bf16.vlgmr.msra.gmra.mrb[4].mxu0 %v5355_v28  ;;  %3398 = vmatmul.mubr.bf16.vlgmr.msra.gmra.mrb[4].mxu1 %v5355_v28 }
 0x18a   : > { %3407 = vmatpush1.bf16.msra.mxu0 %v4581_v32  ;;  %3489 = vmatpush1.bf16.msra.mxu1 %v4584_v36  ;;  %v4674_v32 = vld [vmem:[#allocation5 + $0x5c8] ss:$48 sps:$4 sm:$0xff]   ;;  %v4679_v36 = vld [vmem:[#allocation5 + $0x624] ss:$48 sps:$4 sm:$0xff]  }
 0x18b   : > { %3408 = vmatprep.subr.bf16.mxu0 %v4589_v33  ;;  %3490 = vmatprep.subr.bf16.mxu1 %v4592_v49  ;;  %v4682_v33 = vld [vmem:[#allocation5 + $0x62c] ss:$48 sps:$4 sm:$0xff]   ;;  %v4677_v49 = vld [vmem:[#allocation5 + $0x620] ss:$48 sps:$4 sm:$0xff]  }
 0x18c   : > { %3438 = vmatprep.mubr.bf16.mxu0 %v5238_v16  ;;  %3520 = vmatprep.mubr.bf16.mxu1 %v5238_v16  ;;  %v4608_v16 = vld [vmem:[#allocation5 + $0x1a8] ss:$48 sps:$4 sm:$0xff]  }
 0x18e   : > { %3409 = vmatpush1.bf16.msra.mxu0 %v4587_v37  ;;  %3491 = vmatpush1.bf16.msra.mxu1 %v4590_v54  ;;  %v4680_v37 = vld [vmem:[#allocation5 + $0x628] ss:$48 sps:$4 sm:$0xff]   ;;  %v4685_v54 = vld [vmem:[#allocation5 + $0x684] ss:$48 sps:$4 sm:$0xff]  }
 0x18f   : > { %3410 = vmatprep.subr.bf16.mxu0 %v4595_v10  ;;  %3492 = vmatprep.subr.bf16.mxu1 %v4598_v43  ;;  %v4688_v10 = vld [vmem:[#allocation5 + $0x68c] ss:$48 sps:$4 sm:$0xff]   ;;  %v4683_v43 = vld [vmem:[#allocation5 + $0x680] ss:$48 sps:$4 sm:$0xff]  }
 0x192   : > { %3411 = vmatpush1.bf16.msra.mxu0 %v4593_v56  ;;  %3493 = vmatpush1.bf16.msra.mxu1 %v4596_v38  ;;  %v4686_v56 = vld [vmem:[#allocation5 + $0x688] ss:$48 sps:$4 sm:$0xff]   ;;  %v4691_v38 = vld [vmem:[#allocation5 + $0x6e4] ss:$48 sps:$4 sm:$0xff]  }
 0x193   : > { %3412 = vmatprep.subr.bf16.mxu0 %v4601_v57  ;;  %3494 = vmatprep.subr.bf16.mxu1 %v4604_v58  ;;  %v4694_v57 = vld [vmem:[#allocation5 + $0x6ec] ss:$48 sps:$4 sm:$0xff]   ;;  %v991_v58 = vlaneseq }
 0x196   : > { %3413 = vmatpush1.bf16.msra.mxu0 %v4599_v63  ;;  %3495 = vmatpush1.bf16.msra.mxu1 %v4602_v39  ;;  %v4689_v63 = vld [vmem:[#allocation5 + $0x6e0] ss:$48 sps:$4 sm:$0xff]   ;;  %v4692_v39 = vld [vmem:[#allocation5 + $0x6e8] ss:$48 sps:$4 sm:$0xff]  }
 0x197   : > { %3414 = vmatprep.subr.bf16.mxu0 %v4607_v0  ;;  %3496 = vmatprep.subr.bf16.mxu1 %v4610_v1  ;;  %v4700_v0 = vld [vmem:[#allocation5 + $0x74c] ss:$48 sps:$4 sm:$0xff]   ;;  %v5373_v1 = vshrl.u32 %v991_v58, 7  ;;  %v4749_v58 = vld [vmem:[#allocation5 + $0xaa0] ss:$48 sps:$4 sm:$0xff]  }
 0x19a   : > { %3415 = vmatpush1.bf16.msra.mxu0 %v4605_v8  ;;  %3497 = vmatpush1.bf16.msra.mxu1 %v4608_v16  ;;  %v4695_v8 = vld [vmem:[#allocation5 + $0x740] ss:$48 sps:$4 sm:$0xff]   ;;  %v4698_v16 = vld [vmem:[#allocation5 + $0x748] ss:$48 sps:$4 sm:$0xff]  }
 0x19b   : > { %3416 = vmatprep.subr.bf16.mxu0 %v4613_v9  ;;  %3498 = vmatprep.subr.bf16.mxu1 %v4616_v15  ;;  %v4703_v9 = vld [vmem:[#allocation5 + $0x7a4] ss:$48 sps:$4 sm:$0xff]   ;;  %v4701_v15 = vld [vmem:[#allocation5 + $0x7a0] ss:$48 sps:$4 sm:$0xff]  }
 0x19e   : > { %3417 = vmatpush1.bf16.msra.mxu0 %v4611_v40  ;;  %3499 = vmatpush1.bf16.msra.mxu1 %v4614_v41  ;;  %v993_v40 = vsub.s32 0, %v5373_v1  ;;  %v1001_v41 = vsub.s32 2, %v5373_v1 }
 0x19f   : > { %3418 = vmatprep.subr.bf16.mxu0 %v4619_v42  ;;  %3500 = vmatprep.subr.bf16.mxu1 %v4622_v17  ;;  %v4704_v42 = vld [vmem:[#allocation5 + $0x7a8] ss:$48 sps:$4 sm:$0xff]   ;;  %v5377_v17 = vld [vmem:[#allocation7] sm:$0xff] }
 0x1a2   : > { %3419 = vmatpush1.bf16.msra.mxu0 %v4617_v48  ;;  %3501 = vmatpush1.bf16.msra.mxu1 %v4620_v44  ;;  %v997_v48 = vsub.s32 1, %v5373_v1  ;;  %v1005_v44 = vsub.s32 3, %v5373_v1 }
 0x1a3   : > { %3420 = vmatprep.subr.bf16.mxu0 %v4625_v51  ;;  %3502 = vmatprep.subr.bf16.mxu1 %v4628_v55  ;;  %v4709_v51 = vld [vmem:[#allocation5 + $0x804] ss:$48 sps:$4 sm:$0xff]   ;;  %v4712_v55 = vld [vmem:[#allocation5 + $0x80c] ss:$48 sps:$4 sm:$0xff]  }
 0x1a6   : > { %3421 = vmatpush1.bf16.msra.mxu0 %v4623_v62  ;;  %3503 = vmatpush1.bf16.msra.mxu1 %v4626_v52  ;;  %v994_v62 = vrot.slane %v5377_v17, %v993_v40  ;;  %v1002_v52 = vrot.slane %v5377_v17, %v1001_v41 }
 0x1a7   : > { %3422 = vmatprep.subr.bf16.mxu0 %v4631_v5  ;;  %3504 = vmatprep.subr.bf16.mxu1 %v4634_v45  ;;  %v998_v5 = vrot.slane %v5377_v17, %v997_v48  ;;  %v1006_v45 = vrot.slane %v5377_v17, %v1005_v44 }
 0x1aa   : > { %3423 = vmatpush1.bf16.msra.mxu0 %v4629_v46  ;;  %3505 = vmatpush1.bf16.msra.mxu1 %v4632_v47  ;;  %v4707_v46 = vld [vmem:[#allocation5 + $0x800] ss:$48 sps:$4 sm:$0xff]   ;;  %v4710_v47 = vld [vmem:[#allocation5 + $0x808] ss:$48 sps:$4 sm:$0xff]  }
 0x1ab   : > { %3424 = vmatprep.subr.bf16.mxu0 %v4637_v50  ;;  %3506 = vmatprep.subr.bf16.mxu1 %v4640_v59  ;;  %v4715_v50 = vld [vmem:[#allocation5 + $0x864] ss:$48 sps:$4 sm:$0xff]   ;;  %v4718_v59 = vld [vmem:[#allocation5 + $0x86c] ss:$48 sps:$4 sm:$0xff]  }
 0x1ae   : > { %3425 = vmatpush1.bf16.msra.mxu0 %v4635_v61  ;;  %3507 = vmatpush1.bf16.msra.mxu1 %v4638_v2 }
 0x1af   : > { %3426 = vmatprep.subr.bf16.mxu0 %v4643_v3  ;;  %3508 = vmatprep.subr.bf16.mxu1 %v4646_v60 }
 0x1b2   : > { %3427 = vmatpush1.bf16.msra.mxu0 %v4641_v4  ;;  %3509 = vmatpush1.bf16.msra.mxu1 %v4644_v11 }
 0x1b3   : > { %3428 = vmatprep.subr.bf16.mxu0 %v4649_v13  ;;  %3510 = vmatprep.subr.bf16.mxu1 %v4652_v6 }
 0x1b6   : > { %3429 = vmatpush1.bf16.msra.mxu0 %v4647_v7  ;;  %3511 = vmatpush1.bf16.msra.mxu1 %v4650_v14 }
 0x1b7   : > { %3430 = vmatprep.subr.bf16.mxu0 %v4655_v18  ;;  %3512 = vmatprep.subr.bf16.mxu1 %v4658_v19  ;;  %v4713_v18 = vld [vmem:[#allocation5 + $0x860] ss:$48 sps:$4 sm:$0xff]   ;;  %v4716_v19 = vld [vmem:[#allocation5 + $0x868] ss:$48 sps:$4 sm:$0xff]  }
 0x1ba   : > { %3431 = vmatpush1.bf16.msra.mxu0 %v4653_v12  ;;  %3513 = vmatpush1.bf16.msra.mxu1 %v4656_v21 }
 0x1bb   : > { %3432 = vmatprep.subr.bf16.mxu0 %v4661_v22  ;;  %3514 = vmatprep.subr.bf16.mxu1 %v4664_v20  ;;  %v4721_v22 = vld [vmem:[#allocation5 + $0x8c4] ss:$48 sps:$4 sm:$0xff]   ;;  %v4724_v20 = vld [vmem:[#allocation5 + $0x8cc] ss:$48 sps:$4 sm:$0xff]  }
 0x1be   : > { %3433 = vmatpush1.bf16.msra.mxu0 %v4659_v23  ;;  %3515 = vmatpush1.bf16.msra.mxu1 %v4662_v29  ;;  %v4719_v23 = vld [vmem:[#allocation5 + $0x8c0] ss:$48 sps:$4 sm:$0xff]   ;;  %v4722_v29 = vld [vmem:[#allocation5 + $0x8c8] ss:$48 sps:$4 sm:$0xff]  }
 0x1bf   : > { %3434 = vmatprep.subr.bf16.mxu0 %v4667_v30  ;;  %3516 = vmatprep.subr.bf16.mxu1 %v4670_v34  ;;  %v4727_v30 = vld [vmem:[#allocation5 + $0x924] ss:$48 sps:$4 sm:$0xff]   ;;  %v4730_v34 = vld [vmem:[#allocation5 + $0x92c] ss:$48 sps:$4 sm:$0xff]  }
 0x1c2   : > { %3435 = vmatpush1.bf16.msra.mxu0 %v4665_v35  ;;  %3517 = vmatpush1.bf16.msra.mxu1 %v4668_v24  ;;  %v4725_v35 = vld [vmem:[#allocation5 + $0x920] ss:$48 sps:$4 sm:$0xff]   ;;  %v4728_v24 = vld [vmem:[#allocation5 + $0x928] ss:$48 sps:$4 sm:$0xff]  }
 0x1c3   : > { %3436 = vmatprep.subr.bf16.mxu0 %v4673_v25  ;;  %3518 = vmatprep.subr.bf16.mxu1 %v4676_v27  ;;  %v4733_v25 = vld [vmem:[#allocation5 + $0x984] ss:$48 sps:$4 sm:$0xff]   ;;  %v4736_v27 = vld [vmem:[#allocation5 + $0x98c] ss:$48 sps:$4 sm:$0xff]  }
 0x1c6   : > { %3437 = vmatpush1.bf16.msra.mxu0 %v4671_v31  ;;  %3519 = vmatpush1.bf16.msra.mxu1 %v4674_v32  ;;  %v4731_v31 = vld [vmem:[#allocation5 + $0x980] ss:$48 sps:$4 sm:$0xff]   ;;  %v4734_v32 = vld [vmem:[#allocation5 + $0x988] ss:$48 sps:$4 sm:$0xff]  }
 0x1c7   : > { %3447 = vmatprep.subr.bf16.mxu0 %v4679_v36  ;;  %3529 = vmatprep.subr.bf16.mxu1 %v4682_v33  ;;  %v4739_v36 = vld [vmem:[#allocation5 + $0x9e4] ss:$48 sps:$4 sm:$0xff]   ;;  %v4742_v33 = vld [vmem:[#allocation5 + $0x9ec] ss:$48 sps:$4 sm:$0xff]  }
 0x1c9   : > { %3439 = vmatmul.mubr.bf16.vlgmr.msra.gmra.mrb[8].mxu0 %v5297_v53  ;;  %3521 = vmatmul.mubr.bf16.vlgmr.msra.gmra.mrb[8].mxu1 %v5297_v53  ;;  %v4697_v53 = vld [vmem:[#allocation5 + $0x744] ss:$48 sps:$4 sm:$0xff]  }
 0x1ca   : > { %3448 = vmatpush1.bf16.msra.mxu0 %v4677_v49  ;;  %3530 = vmatpush1.bf16.msra.mxu1 %v4680_v37  ;;  %v4737_v49 = vld [vmem:[#allocation5 + $0x9e0] ss:$48 sps:$4 sm:$0xff]   ;;  %v4740_v37 = vld [vmem:[#allocation5 + $0x9e8] ss:$48 sps:$4 sm:$0xff]  }
 0x1cb   : > { %3449 = vmatprep.subr.bf16.mxu0 %v4685_v54  ;;  %3531 = vmatprep.subr.bf16.mxu1 %v4688_v10  ;;  %v4745_v54 = vld [vmem:[#allocation5 + $0xa44] ss:$48 sps:$4 sm:$0xff]   ;;  %v4748_v10 = vld [vmem:[#allocation5 + $0xa4c] ss:$48 sps:$4 sm:$0xff]  }
 0x1cc   : > { %3479 = vmatprep.mubr.bf16.mxu0 %v5344_v26  ;;  %3561 = vmatprep.mubr.bf16.mxu1 %v5344_v26  ;;  %v4706_v26 = vld [vmem:[#allocation5 + $0x7ac] ss:$48 sps:$4 sm:$0xff]  }
 0x1ce   : > { %3450 = vmatpush1.bf16.msra.mxu0 %v4683_v43  ;;  %3532 = vmatpush1.bf16.msra.mxu1 %v4686_v56  ;;  %v4743_v43 = vld [vmem:[#allocation5 + $0xa40] ss:$48 sps:$4 sm:$0xff]   ;;  %v4746_v56 = vld [vmem:[#allocation5 + $0xa48] ss:$48 sps:$4 sm:$0xff]  }
 0x1cf   : > { %3451 = vmatprep.subr.bf16.mxu0 %v4691_v38  ;;  %3533 = vmatprep.subr.bf16.mxu1 %v4694_v57  ;;  %v4751_v38 = vld [vmem:[#allocation5 + $0xaa4] ss:$48 sps:$4 sm:$0xff]   ;;  %v4754_v57 = vld [vmem:[#allocation5 + $0xaac] ss:$48 sps:$4 sm:$0xff]  }
 0x1d2   : > { %3452 = vmatpush1.bf16.msra.mxu0 %v4689_v63  ;;  %3534 = vmatpush1.bf16.msra.mxu1 %v4692_v39  ;;  %v4752_v63 = vld [vmem:[#allocation5 + $0xaa8] ss:$48 sps:$4 sm:$0xff]   ;;  %v4757_v39 = vld [vmem:[#allocation5 + $0xb04] ss:$48 sps:$4 sm:$0xff]  }
 0x1d3   : > { %3453 = vmatprep.subr.bf16.mxu0 %v4697_v53  ;;  %3535 = vmatprep.subr.bf16.mxu1 %v4700_v0  ;;  %v4760_v53 = vld [vmem:[#allocation5 + $0xb0c] ss:$48 sps:$4 sm:$0xff]   ;;  %v4755_v0 = vld [vmem:[#allocation5 + $0xb00] ss:$48 sps:$4 sm:$0xff]  }
 0x1d6   : > { %3454 = vmatpush1.bf16.msra.mxu0 %v4695_v8  ;;  %3536 = vmatpush1.bf16.msra.mxu1 %v4698_v16  ;;  %v4758_v8 = vld [vmem:[#allocation5 + $0xb08] ss:$48 sps:$4 sm:$0xff]   ;;  %v4763_v16 = vld [vmem:[#allocation5 + $0xb64] ss:$48 sps:$4 sm:$0xff]  }
 0x1d7   : > { %3455 = vmatprep.subr.bf16.mxu0 %v4703_v9  ;;  %3537 = vmatprep.subr.bf16.mxu1 %v4706_v26  ;;  %v4766_v9 = vld [vmem:[#allocation5 + $0xb6c] ss:$48 sps:$4 sm:$0xff]   ;;  %v4761_v26 = vld [vmem:[#allocation5 + $0xb60] ss:$48 sps:$4 sm:$0xff]  }
 0x1da   : > { %3456 = vmatpush1.bf16.msra.mxu0 %v4701_v15  ;;  %3538 = vmatpush1.bf16.msra.mxu1 %v4704_v42  ;;  %v4764_v15 = vld [vmem:[#allocation5 + $0xb68] ss:$48 sps:$4 sm:$0xff]   ;;  %v4769_v42 = vld [vmem:[#allocation5 + $0xbc4] ss:$48 sps:$4 sm:$0xff]  }
 0x1db   : > { %3457 = vmatprep.subr.bf16.mxu0 %v4709_v51  ;;  %3539 = vmatprep.subr.bf16.mxu1 %v4712_v55  ;;  %v4772_v51 = vld [vmem:[#allocation5 + $0xbcc] ss:$48 sps:$4 sm:$0xff]   ;;  %v4767_v55 = vld [vmem:[#allocation5 + $0xbc0] ss:$48 sps:$4 sm:$0xff]  }
 0x1dc   : > { %v3153_v61 = vpop.f32.mrb[0].mxu0  ;;  %v3235_v2 = vpop.f32.mrb[0].mxu1 }
 0x1dd   : > { %v4088_v3 = vadd.f32 %v3153_v61, %v994_v62  ;;  %v4090_v60 = vadd.f32 %v3235_v2, %v1002_v52  ;;  %v3155_v4 = vpop.f32.mrb[1].mxu0  ;;  %v3237_v11 = vpop.f32.mrb[1].mxu1  ;;  %v4770_v62 = vld [vmem:[#allocation5 + $0xbc8] ss:$48 sps:$4 sm:$0xff]   ;;  %v1009_v52 = vsub.s32 4, %v5373_v1 }
 0x1de   : > { %v4089_v13 = vadd.f32 %v3155_v4, %v998_v5  ;;  %v4091_v6 = vadd.f32 %v3237_v11, %v1006_v45  ;;  %v3157_v7 = vpop.f32.mrb[2].mxu0  ;;  %v3239_v14 = vpop.f32.mrb[2].mxu1  ;;  %3458 = vmatpush1.bf16.msra.mxu0 %v4707_v46  ;;  %3540 = vmatpush1.bf16.msra.mxu1 %v4710_v47  ;;  %v1017_v5 = vsub.s32 6, %v5373_v1  ;;  %v1013_v45 = vsub.s32 5, %v5373_v1 }
 0x1df   : > { %3570 = vst [vmem:[%s5394_s20] sm:$0xff] %v4088_v3  ;;  %3572 = vst [vmem:[%s5394_s20 + $0x10] sm:$0xff] %v4090_v60  ;;  %v3158_v12 = vpop.f32.mrb[3].mxu0  ;;  %v3240_v21 = vpop.f32.mrb[3].mxu1  ;;  %3459 = vmatprep.subr.bf16.mxu0 %v4715_v50  ;;  %3541 = vmatprep.subr.bf16.mxu1 %v4718_v59  ;;  %v1021_v46 = vsub.s32 7, %v5373_v1  ;;  %v1010_v47 = vrot.slane %v5377_v17, %v1009_v52 }
 0x1e0   : > { %3571 = vst [vmem:[%s5394_s20 + $0x8] sm:$0xff] %v4089_v13  ;;  %3573 = vst [vmem:[%s5394_s20 + $0x18] sm:$0xff] %v4091_v6  ;;  %v1018_v50 = vrot.slane %v5377_v17, %v1017_v5  ;;  %v1014_v59 = vrot.slane %v5377_v17, %v1013_v45 }
 0x1e1   : > { %v1022_v61 = vrot.slane %v5377_v17, %v1021_v46  ;;  %v988_v17 = vld [vmem:[#allocation7 + $0x8] sm:$0xf] }
 0x1e2   : > { %3460 = vmatpush1.bf16.msra.mxu0 %v4713_v18  ;;  %3542 = vmatpush1.bf16.msra.mxu1 %v4716_v19  ;;  %v1026_v12 = vrot.slane %v988_v17, %v993_v40  ;;  %v1034_v21 = vrot.slane %v988_v17, %v1001_v41 }
 0x1e3   : > { %3461 = vmatprep.subr.bf16.mxu0 %v4721_v22  ;;  %3543 = vmatprep.subr.bf16.mxu1 %v4724_v20  ;;  %v1030_v22 = vrot.slane %v988_v17, %v997_v48  ;;  %v1038_v20 = vrot.slane %v988_v17, %v1005_v44 }
 0x1e6   : > { %3462 = vmatpush1.bf16.msra.mxu0 %v4719_v23  ;;  %3544 = vmatpush1.bf16.msra.mxu1 %v4722_v29 }
 0x1e7   : > { %3463 = vmatprep.subr.bf16.mxu0 %v4727_v30  ;;  %3545 = vmatprep.subr.bf16.mxu1 %v4730_v34 }
 0x1ea   : > { %3464 = vmatpush1.bf16.msra.mxu0 %v4725_v35  ;;  %3546 = vmatpush1.bf16.msra.mxu1 %v4728_v24 }
 0x1eb   : > { %3465 = vmatprep.subr.bf16.mxu0 %v4733_v25  ;;  %3547 = vmatprep.subr.bf16.mxu1 %v4736_v27 }
 0x1ee   : > { %3466 = vmatpush1.bf16.msra.mxu0 %v4731_v31  ;;  %3548 = vmatpush1.bf16.msra.mxu1 %v4734_v32 }
 0x1ef   : > { %3467 = vmatprep.subr.bf16.mxu0 %v4739_v36  ;;  %3549 = vmatprep.subr.bf16.mxu1 %v4742_v33 }
 0x1f2   : > { %3468 = vmatpush1.bf16.msra.mxu0 %v4737_v49  ;;  %3550 = vmatpush1.bf16.msra.mxu1 %v4740_v37 }
 0x1f3   : > { %3469 = vmatprep.subr.bf16.mxu0 %v4745_v54  ;;  %3551 = vmatprep.subr.bf16.mxu1 %v4748_v10 }
 0x1f6   : > { %3470 = vmatpush1.bf16.msra.mxu0 %v4743_v43  ;;  %3552 = vmatpush1.bf16.msra.mxu1 %v4746_v56 }
 0x1f7   : > { %3471 = vmatprep.subr.bf16.mxu0 %v4751_v38  ;;  %3553 = vmatprep.subr.bf16.mxu1 %v4754_v57 }
 0x1fa   : > { %3472 = vmatpush1.bf16.msra.mxu0 %v4749_v58  ;;  %3554 = vmatpush1.bf16.msra.mxu1 %v4752_v63 }
 0x1fb   : > { %3473 = vmatprep.subr.bf16.mxu0 %v4757_v39  ;;  %3555 = vmatprep.subr.bf16.mxu1 %v4760_v53 }
 0x1fe   : > { %3474 = vmatpush1.bf16.msra.mxu0 %v4755_v0  ;;  %3556 = vmatpush1.bf16.msra.mxu1 %v4758_v8 }
 0x1ff   : > { %3475 = vmatprep.subr.bf16.mxu0 %v4763_v16  ;;  %3557 = vmatprep.subr.bf16.mxu1 %v4766_v9 }
 0x202   : > { %3476 = vmatpush1.bf16.msra.mxu0 %v4761_v26  ;;  %3558 = vmatpush1.bf16.msra.mxu1 %v4764_v15 }
 0x203   : > { %3477 = vmatprep.subr.bf16.mxu0 %v4769_v42  ;;  %3559 = vmatprep.subr.bf16.mxu1 %v4772_v51 }
 0x206   : > { %3478 = vmatpush1.bf16.msra.mxu0 %v4767_v55  ;;  %3560 = vmatpush1.bf16.msra.mxu1 %v4770_v62 }
 0x209   : > { %3480 = vmatmul.mubr.bf16.vlgmr.msra.gmra.mrb[8].mxu0 %v5355_v28  ;;  %3562 = vmatmul.mubr.bf16.vlgmr.msra.gmra.mrb[8].mxu1 %v5355_v28 }
 0x25c   : > { %v3317_v28 = vpop.f32.mrb[4].mxu0  ;;  %v3399_v2 = vpop.f32.mrb[4].mxu1 }
 0x25d   : > { %v4092_v3 = vadd.f32 %v3317_v28, %v1010_v47  ;;  %v4094_v60 = vadd.f32 %v3399_v2, %v1018_v50  ;;  %v3319_v4 = vpop.f32.mrb[5].mxu0  ;;  %v3401_v11 = vpop.f32.mrb[5].mxu1 }
 0x25e   : > { %v4093_v13 = vadd.f32 %v3319_v4, %v1014_v59  ;;  %v4095_v6 = vadd.f32 %v3401_v11, %v1022_v61  ;;  %v3321_v7 = vpop.f32.mrb[6].mxu0  ;;  %v3403_v14 = vpop.f32.mrb[6].mxu1 }
 0x25f   : > { %3574 = vst [vmem:[%s5394_s20 + $0x20] sm:$0xff] %v4092_v3  ;;  %3576 = vst [vmem:[%s5394_s20 + $0x30] sm:$0xff] %v4094_v60  ;;  %v3322_v18 = vpop.f32.mrb[7].mxu0  ;;  %v3404_v19 = vpop.f32.mrb[7].mxu1 }
 0x260   : > { %3575 = vst [vmem:[%s5394_s20 + $0x28] sm:$0xff] %v4093_v13  ;;  %3577 = vst [vmem:[%s5394_s20 + $0x38] sm:$0xff] %v4095_v6 }
 0x2dc   : > { %v3481_v23 = vpop.f32.mrb[8].mxu0  ;;  %v3563_v29 = vpop.f32.mrb[8].mxu1 }
 0x2dd   : > { %v4096_v30 = vadd.f32 %v3481_v23, %v1026_v12  ;;  %v4098_v40 = vadd.f32 %v3563_v29, %v1034_v21  ;;  %v3483_v34 = vpop.f32.mrb[9].mxu0  ;;  %v3565_v35 = vpop.f32.mrb[9].mxu1 }
 0x2de   : > { %v4097_v41 = vadd.f32 %v3483_v34, %v1030_v22  ;;  %v4099_v24 = vadd.f32 %v3565_v35, %v1038_v20  ;;  %v3485_v48 = vpop.f32.mrb[10].mxu0  ;;  %v3567_v25 = vpop.f32.mrb[10].mxu1 }
 0x2df   : > { %3578 = vst [vmem:[%s5394_s20 + $0x40] sm:$0xff] %v4096_v30  ;;  %3580 = vst [vmem:[%s5394_s20 + $0x50] sm:$0xff] %v4098_v40  ;;  %v3486_v1 = vpop.f32.mrb[11].mxu0  ;;  %v3568_v44 = vpop.f32.mrb[11].mxu1 }
 0x2e0   : > { %3579 = vst [vmem:[%s5394_s20 + $0x48] sm:$0xff] %v4097_v41  ;;  %3581 = vst [vmem:[%s5394_s20 + $0x58] sm:$0xff] %v4099_v24 }
 0x2e1   : > { %4872 = shalt.err (!%p4869_p2)
}
 0x2e2   : > { %s4873_s10 = scalar_lea.hbm %s5427_s23, 1536  ;;  %s4877_s28 = scalar_lea.hbm %s5478_s3, 3072 }
 0x2e3   : > { %p4874_p13 = scmp.ne.s32.totalorder %s5427_s23, %s4873_s10  ;;  %p4878_p4 = scmp.lt.u32.totalorder %s5427_s23, %s5478_s3 }
 0x2e4   : > { %p4879_p5 = scmp.lt.u32.totalorder %s4877_s28, %s4873_s10  ;;  %p4881_p11 = scmp.lt.u32.totalorder %s4873_s10, %s5427_s23 }
 0x2e5   : > { %p4875_p6 = pnand %p4874_p13, %p5492_p0 }
 0x2e6   : > { %p4880_p8 = por %p4879_p5, %p4878_p4 }
 0x2e7   : > { %p4876_p10 = pneg %p4875_p6 }
 0x2e8   : > { %p4882_p1 = por %p4881_p11, %p4880_p8 }
 0x2ea   : > { %p4883_p3 = pnand %p4882_p1, %p4876_p10 }
 0x2ec   : > { %4886 = shalt.err (!%p4883_p3)
}
 0x2ed   : > { %4136 = dma.vmem_to_hbm [thread:$0]  (%p5492_p0), %s5429_s24, 1536, %s5427_s23, %s3583_s16  }
 0x2ee PF: > { %s3609_s30 = sand.u32 1, %s4917_s12   ;;  %p5493_p7 = scmp.ne.s32.totalorder %s5483_s19, 0 }
 0x2ef   : > { %p5494_p9 = scmp.ge.s32.totalorder %s4929_s15, 2  ;;  %s3610_s18 = scalar_lea.sflag [#allocation4], %s3609_s30 }
 0x2f1   : > { %p4150_p12 = pnand %p5494_p9, %p5493_p7 }
 0x2f3   : > { %4912 = dma.done.wait (!%p4150_p12), %s3610_s18, 1536  }
 0x2f4   : > { %4914 = vsyncadd (!%p4150_p12), %s3610_s18, 4294965760  ;;  %p17_p2 = scmp.ge.s32.totalorder %s5069_s4, 4   ;;  %s5495_s12 = smov %s4921_s13 }
 0x2f5   : > { %s5496_s13 = smov %s4925_s14  ;;  %s5497_s14 = smov %s5085_s7 }
 0x2f6   : > { %s5498_s15 = smov %s5069_s4  ;;  %19 = sbr.rel (!%p17_p2) target bundleno = 6 (0x6), region = 85 }
 0x2fd   :  { %3615 = vsyncpa [#allocation3], 1 }
 0x2fe   :  { %3617 = vsyncpa [#allocation3 + $0x1], 1 }
 0x2ff   :  { %3618 = vsyncpa [#allocation6], 1 }
 0x300   :  { %3619 = vsyncpa [#allocation4], 1 }
 0x301   :  { %3621 = vsyncpa [#allocation4 + $0x1], 1 }

</bundles_post_ra>
